<compile_context>
chip_gen: v7x
topology: tpu7x:2x2x1
jax: 0.10.0
libtpu: 0.0.40
codegen_flags: <defaults>
</compile_context>

<pallas_src>
import math

import jax
import jax.numpy as jnp
from jax.experimental import pallas as pl
from jax.experimental.pallas import tpu as pltpu


def _make_periodic_kernel(freqs):
    """Kernel factory: frequencies f_k = 2*pi/p_k baked in as constants."""

    def kernel(x_ref, o_ref):
        # x_ref : VMEM (TB, TN)       -- one tile of the input
        # o_ref : VMEM (2K, TB, TN)   -- all sin/cos rows for this tile
        x = x_ref[...].astype(jnp.float32)          # keep phase math in f32
        for k, f in enumerate(freqs):               # K is tiny -> fully unrolled
            phase = f * x                           # single VPU mul, reused twice
            o_ref[2 * k] = jnp.sin(phase).astype(o_ref.dtype)
            o_ref[2 * k + 1] = jnp.cos(phase).astype(o_ref.dtype)

    return kernel


def _pick_tiles(B, N, K, in_itemsize, out_itemsize,
                max_lane_tile=2048, vmem_budget_bytes=16 * 1024 * 1024):
    """Largest (row, lane) tile pair whose double-buffered in+out footprint
    stays under a conservative budget (safe even for v7x's smaller VMEM)."""

    def buffered_bytes(tb, tn):
        per_tile = tb * tn * in_itemsize + 2 * K * tb * tn * out_itemsize
        return 2 * per_tile                         # Pallas double-buffers

    # Lane tile: full N if tiny, else a multiple of 128.
    tn = N if N <= 128 else min(max_lane_tile, max(128, (N // 128) * 128))
    tb = B                                          # full B unless we must split

    # Shrink the lane tile first (keeps stores lane-dense as long as possible).
    while tn > 128 and buffered_bytes(tb, tn) > vmem_budget_bytes:
        tn -= 128

    # If still over budget, tile rows too (only legal when B is a multiple of 8).
    if buffered_bytes(tb, tn) > vmem_budget_bytes and B % 8 == 0 and B > 8:
        tb = 8 * max(1, (B // 8) // 2)
        while tb > 8 and buffered_bytes(tb, tn) > vmem_budget_bytes:
            tb -= 8

    return tb, tn


def periodic_embedding(x, periods, *, out_dtype=None):
    """x: (B, N); periods: list of K floats. Returns (2K, B, N) with rows
    ordered [sin_0, cos_0, sin_1, cos_1, ...]."""
    B, N = x.shape
    K = len(periods)
    freqs = tuple(2.0 * math.pi / float(p) for p in periods)
    out_dtype = jnp.dtype(x.dtype) if out_dtype is None else jnp.dtype(out_dtype)

    tb, tn = _pick_tiles(B, N, K,
                         jnp.dtype(x.dtype).itemsize, out_dtype.itemsize)
    grid = (pl.cdiv(B, tb), pl.cdiv(N, tn))

    return pl.pallas_call(
        _make_periodic_kernel(freqs),
        out_shape=jax.ShapeDtypeStruct((2 * K, B, N), out_dtype),
        grid=grid,
        in_specs=[pl.BlockSpec((tb, tn), lambda i, j: (i, j))],
        out_specs=pl.BlockSpec((2 * K, tb, tn), lambda i, j: (0, i, j)),
        compiler_params=pltpu.CompilerParams(
            dimension_semantics=("parallel", "parallel"),   # independent tiles
        ),
    )(x)


def periodic_embedding_ref(x, periods):
    outs = []
    for p in periods:
        f = 2.0 * math.pi / p
        outs.append(jnp.stack([jnp.sin(f * x), jnp.cos(f * x)], axis=0))
    return jnp.concatenate(outs, axis=0)


if __name__ == "__main__":
    # args equivalent: [(1.0, 'fixed'), (2.0, 'train'), (0.5, 'fixed')]
    # ('train' periods are initialized to their given value -> same forward at init)
    periods = [1.0, 2.0, 0.5]

    key = jax.random.PRNGKey(0)
    B, N = 8, 512
    x = jax.random.normal(key, (B, N), dtype=jnp.float32)

    y = periodic_embedding(x, periods)
    y = jax.block_until_ready(y)

    y_ref = periodic_embedding_ref(x, periods)
    assert y.shape == (2 * len(periods), B, N)
    assert jnp.allclose(y, y_ref, atol=1e-5, rtol=1e-5), "mismatch vs reference"

    print("KERNEL_OK")
</pallas_src>

<mosaic_0001>
module attributes {stable_mosaic.version = 11 : i64} {
  func.func @kernel(%arg0: i32, %arg1: i32, %arg2: memref<8x512xf32, #tpu.memory_space<vmem>>, %arg3: memref<6x8x512xf32, #tpu.memory_space<vmem>>) attributes {dimension_semantics = [#tpu.dimension_semantics<parallel>, #tpu.dimension_semantics<parallel>], iteration_bounds = array<i64: 1, 1>, scalar_prefetch = 0 : i64, scratch_operands = 0 : i64, tpu.core_type = #tpu.core_type<tc>, window_params = [{transform_indices = @transform_0, window_bounds = array<i64: 8, 512>}, {transform_indices = @transform_1, window_bounds = array<i64: 6, 8, 512>}]} {
    %c0 = arith.constant 0 : index
    %c0_0 = arith.constant 0 : index
    %0 = vector.load %arg2[%c0, %c0_0] : memref<8x512xf32, #tpu.memory_space<vmem>>, vector<8x512xf32>
    %cst = arith.constant 6.28318548 : f32
    %1 = vector.broadcast %cst : f32 to vector<8x512xf32>
    %2 = arith.mulf %1, %0 : vector<8x512xf32>
    %3 = math.sin %2 : vector<8x512xf32>
    %c0_1 = arith.constant 0 : index
    %c0_2 = arith.constant 0 : index
    %c0_3 = arith.constant 0 : index
    %4 = vector.load %arg3[%c0_1, %c0_2, %c0_3] : memref<6x8x512xf32, #tpu.memory_space<vmem>>, vector<1x8x512xf32>
    %5 = vector.shape_cast %4 : vector<1x8x512xf32> to vector<8x512xf32>
    %6 = vector.shape_cast %3 : vector<8x512xf32> to vector<1x8x512xf32>
    tpu.vector_store %arg3[%c0_1, %c0_2, %c0_3], %6 {strides = array<i32>} : memref<6x8x512xf32, #tpu.memory_space<vmem>>, vector<1x8x512xf32>,
    %7 = math.cos %2 : vector<8x512xf32>
    %c1 = arith.constant 1 : index
    %c0_4 = arith.constant 0 : index
    %c0_5 = arith.constant 0 : index
    %8 = vector.load %arg3[%c1, %c0_4, %c0_5] : memref<6x8x512xf32, #tpu.memory_space<vmem>>, vector<1x8x512xf32>
    %9 = vector.shape_cast %8 : vector<1x8x512xf32> to vector<8x512xf32>
    %10 = vector.shape_cast %7 : vector<8x512xf32> to vector<1x8x512xf32>
    tpu.vector_store %arg3[%c1, %c0_4, %c0_5], %10 {strides = array<i32>} : memref<6x8x512xf32, #tpu.memory_space<vmem>>, vector<1x8x512xf32>,
    %cst_6 = arith.constant 3.14159274 : f32
    %11 = vector.broadcast %cst_6 : f32 to vector<8x512xf32>
    %12 = arith.mulf %11, %0 : vector<8x512xf32>
    %13 = math.sin %12 : vector<8x512xf32>
    %c2 = arith.constant 2 : index
    %c0_7 = arith.constant 0 : index
    %c0_8 = arith.constant 0 : index
    %14 = vector.load %arg3[%c2, %c0_7, %c0_8] : memref<6x8x512xf32, #tpu.memory_space<vmem>>, vector<1x8x512xf32>
    %15 = vector.shape_cast %14 : vector<1x8x512xf32> to vector<8x512xf32>
    %16 = vector.shape_cast %13 : vector<8x512xf32> to vector<1x8x512xf32>
    tpu.vector_store %arg3[%c2, %c0_7, %c0_8], %16 {strides = array<i32>} : memref<6x8x512xf32, #tpu.memory_space<vmem>>, vector<1x8x512xf32>,
    %17 = math.cos %12 : vector<8x512xf32>
    %c3 = arith.constant 3 : index
    %c0_9 = arith.constant 0 : index
    %c0_10 = arith.constant 0 : index
    %18 = vector.load %arg3[%c3, %c0_9, %c0_10] : memref<6x8x512xf32, #tpu.memory_space<vmem>>, vector<1x8x512xf32>
    %19 = vector.shape_cast %18 : vector<1x8x512xf32> to vector<8x512xf32>
    %20 = vector.shape_cast %17 : vector<8x512xf32> to vector<1x8x512xf32>
    tpu.vector_store %arg3[%c3, %c0_9, %c0_10], %20 {strides = array<i32>} : memref<6x8x512xf32, #tpu.memory_space<vmem>>, vector<1x8x512xf32>,
    %cst_11 = arith.constant 12.566371 : f32
    %21 = vector.broadcast %cst_11 : f32 to vector<8x512xf32>
    %22 = arith.mulf %21, %0 : vector<8x512xf32>
    %23 = math.sin %22 : vector<8x512xf32>
    %c4 = arith.constant 4 : index
    %c0_12 = arith.constant 0 : index
    %c0_13 = arith.constant 0 : index
    %24 = vector.load %arg3[%c4, %c0_12, %c0_13] : memref<6x8x512xf32, #tpu.memory_space<vmem>>, vector<1x8x512xf32>
    %25 = vector.shape_cast %24 : vector<1x8x512xf32> to vector<8x512xf32>
    %26 = vector.shape_cast %23 : vector<8x512xf32> to vector<1x8x512xf32>
    tpu.vector_store %arg3[%c4, %c0_12, %c0_13], %26 {strides = array<i32>} : memref<6x8x512xf32, #tpu.memory_space<vmem>>, vector<1x8x512xf32>,
    %27 = math.cos %22 : vector<8x512xf32>
    %c5 = arith.constant 5 : index
    %c0_14 = arith.constant 0 : index
    %c0_15 = arith.constant 0 : index
    %28 = vector.load %arg3[%c5, %c0_14, %c0_15] : memref<6x8x512xf32, #tpu.memory_space<vmem>>, vector<1x8x512xf32>
    %29 = vector.shape_cast %28 : vector<1x8x512xf32> to vector<8x512xf32>
    %30 = vector.shape_cast %27 : vector<8x512xf32> to vector<1x8x512xf32>
    tpu.vector_store %arg3[%c5, %c0_14, %c0_15], %30 {strides = array<i32>} : memref<6x8x512xf32, #tpu.memory_space<vmem>>, vector<1x8x512xf32>,
    return
  }
  func.func @transform_0(%arg0: i32, %arg1: i32) -> (i32, i32) {
    %c0_i32 = arith.constant 0 : i32
    return %arg0, %arg1 : i32, i32
  }
  func.func @transform_1(%arg0: i32, %arg1: i32) -> (i32, i32, i32) {
    %c0_i32 = arith.constant 0 : i32
    %c0_i32_0 = arith.constant 0 : i32
    return %c0_i32, %arg0, %arg1 : i32, i32, i32
  }
}

</mosaic_0001>

<bundles_post_ra>
// kernel: tpu_custom_call.1
= control target key start
LH: loop header
LB: loop body
LE: loop exit
PB: predicated region body
PF: predicated region fallthrough
CT: control target
= control target key end

     0   :  { %6 = vsyncpa [#allocation3], 0  ;;  %s4048_s0 = inlined_call_operand.hbm [shape: f32[8,512], index: 0, kind: input, shape index: {}]   ;;  %s4049_s1 = inlined_call_operand.hbm [shape: f32[6,8,512], index: 1, kind: output, shape index: {}]  }
   0x1   :  { %7 = vsyncpa [#allocation4], 0  ;;  %s2821_s6 = smov [#allocation2]   ;;  %s2773_s10 = scalar_lea.hbm %s4048_s0, 512 }
   0x2   :  { %s14_s7 = sshll.u32 %s2821_s6, 4  ;;  %p2774_p0 = scmp.ne.s32.totalorder %s4048_s0, %s2773_s10  ;;  %s15_s7 = int_to_ptr.vmem [resolvable:$true] %s14_s7 }
   0x3   :  { %p2777_p1 = scmp.lt.u32.totalorder %s2773_s10, %s4048_s0 }
   0x5   :  { %p2779_p2 = pnand %p2777_p1, %p2774_p0 }
   0x7   :  { %2782 = shalt.err (!%p2779_p2)
}
   0x8   :  { %s2783_s15 = scalar_lea.vmem %s15_s7, 512  ;;  %p2788_p4 = scmp.lt.s32.totalorder %s15_s7, %s15_s7 }
   0x9   :  { %p2784_p3 = scmp.ne.s32.totalorder %s15_s7, %s2783_s15  ;;  %p2789_p5 = scmp.lt.s32.totalorder %s2783_s15, %s2783_s15 }
   0xb   :  { %p2790_p6 = por %p2789_p5, %p2788_p4 }
   0xd   :  { %p2791_p7 = pnand %p2790_p6, %p2784_p3 }
   0xf   :  { %2794 = shalt.err (!%p2791_p7)
}
  0x10   :  { %17 = dma.hbm_to_vmem [thread:$0]  %s4048_s0, 512, %s15_s7, [#allocation3]  }
  0x11   :  { %2817 = dma.done.wait [#allocation3], 512  }
  0x12   :  { %2818 = vsyncadd [#allocation3], 4294966784  ;;  %v2853_v0 = vld [vmem:[#allocation2] sm:$0xff]  ;;  %v2855_v1 = vld [vmem:[#allocation2 + $0x8] sm:$0xff]  ;;  %v2822_v36 = vmov 683565275  }
  0x13   :  { %v2857_v2 = vld [vmem:[#allocation2 + $0x10] sm:$0xff]  ;;  %v2860_v3 = vmul.f32 6.2831855, %v2853_v0  ;;  %v2863_v4 = vmul.f32 6.2831855, %v2855_v1  ;;  %v24_v20 = vld [vmem:[#allocation2 + $0x18] sm:$0xff] }
  0x14   :  { %v2866_v5 = vmul.f32 6.2831855, %v2857_v2  ;;  %v2878_v26 = vmul.f32 6.2831855, %v24_v20  ;;  %v2823_v38 = vmov 2475754826  }
  0x15   :  { %v29_v6 = vand.u32 2147483647, %v2860_v3  ;;  %v32_v7 = vand.u32 2139095040, %v2860_v3  ;;  %v133_v8 = vand.u32 2147483647, %v2863_v4  ;;  %v136_v9 = vand.u32 2139095040, %v2863_v4 }
  0x16   :  { %v240_v14 = vand.u32 2139095040, %v2866_v5  ;;  %v237_v23 = vand.u32 2147483647, %v2866_v5  ;;  %v2824_v40 = vmov 2131351028   ;;  %vm31_vm13 = vcmp.lt.s32.totalorder %v2860_v3, 0 }
  0x17   :  { %v33_v10 = vshrl.u32 %v32_v7, 23  ;;  %v36_v11 = vand.u32 8388607, %v29_v6  ;;  %v137_v12 = vshrl.u32 %v136_v9, 23  ;;  %v140_v13 = vand.u32 8388607, %v133_v8 }
  0x18   :  { %v241_v17 = vshrl.u32 %v240_v14, 23  ;;  %v2886_v33 = vand.u32 8388607, %v237_v23  ;;  %v2825_v42 = vmov 2102212464   ;;  %vm135_vm14 = vcmp.lt.s32.totalorder %v2863_v4, 0 }
  0x19   :  { %v2567_v15 = vadd.s32 4294967169, %v33_v10  ;;  %v2571_v16 = vadd.s32 4294967169, %v137_v12  ;;  %v37_v18 = vor.u32 8388608, %v36_v11  ;;  %v141_v21 = vor.u32 8388608, %v140_v13  ;;  %s2828_s0 = smov [#allocation5]  }
  0x1a   :  { %v2575_v24 = vadd.s32 4294967169, %v241_v17  ;;  %v2826_v44 = vmov 920167782   ;;  %v2827_v52 = vmov 1326507024   ;;  %s2555_s18 = sshll.u32 %s2828_s0, 4  ;;  %s2556_s18 = int_to_ptr.vmem [resolvable:$true] %s2555_s18 }
  0x1b   :  { %v39_v19 = vadd.s32 1, %v2567_v15  ;;  %v143_v22 = vadd.s32 1, %v2571_v16  ;;  %v2880_v29 = vshll.u32 %v37_v18, 8  ;;  %v2882_v32 = vshll.u32 %v141_v21, 8  ;;  %s2795_s19 = scalar_lea.vmem %s2556_s18, 3072  ;;  %p2800_p9 = scmp.lt.s32.totalorder %s2556_s18, %s2556_s18 }
  0x1c   :  { %v2888_v34 = vadd.s32 1, %v2575_v24  ;;  %p2796_p8 = scmp.ne.s32.totalorder %s2556_s18, %s2795_s19  ;;  %p2801_p10 = scmp.lt.s32.totalorder %s2795_s19, %s2795_s19 }
  0x1d   :  { %vm40_vm0 = vcmp.gt.s32.totalorder %v39_v19, 0  ;;  %vm144_vm1 = vcmp.gt.s32.totalorder %v143_v22, 0 }
  0x1e   :  { %v41_v25 = vsel %vm40_vm0, %v39_v19, 0  ;;  %v145_v30 = vsel %vm144_vm1, %v143_v22, 0  ;;  %vm248_vm6 = vcmp.gt.s32.totalorder %v2888_v34, 0  ;;  %vm2992_vm1 = vcmp.le.f32.partialorder %v29_v6, 0.7853982  ;;  %p2802_p11 = por %p2801_p10, %p2800_p9 }
  0x1f   :  { %v42_v27 = vshrl.u32 %v41_v25, 5  ;;  %v43_v28 = vand.u32 31, %v41_v25  ;;  %v147_v31 = vand.u32 31, %v145_v30  ;;  %v2895_v46 = vshrl.u32 %v145_v30, 5 }
  0x20   :  { %p2803_p12 = pnand %p2802_p11, %p2796_p8 }
  0x21   :  { %v44_v35 = vsub.s32 32, %v43_v28  ;;  %v46_v37 = vshll.u32 %v2822_v36, %v43_v28  ;;  %v49_v39 = vshll.u32 %v2823_v38, %v43_v28  ;;  %v52_v41 = vshll.u32 %v2824_v40, %v43_v28 }
  0x22   :  { %v55_v43 = vshll.u32 %v2825_v42, %v43_v28  ;;  %v58_v45 = vshll.u32 %v2826_v44, %v43_v28  ;;  %vm61_vm2 = vcmp.lt.s32.totalorder %v42_v27, 1  ;;  %vm62_vm3 = vcmp.lt.s32.totalorder %v42_v27, 2 }
  0x23   :  { %v45_v47 = vshrl.u32 %v2822_v36, %v44_v35  ;;  %v47_v48 = vshrl.u32 %v2823_v38, %v44_v35  ;;  %v50_v49 = vshrl.u32 %v2824_v40, %v44_v35  ;;  %v53_v50 = vshrl.u32 %v2825_v42, %v44_v35 }
  0x24   :  { %v56_v51 = vshrl.u32 %v2826_v44, %v44_v35  ;;  %v59_v53 = vshrl.u32 %v2827_v52, %v44_v35  ;;  %vm64_vm4 = vcmp.lt.s32.totalorder %v42_v27, 4  ;;  %v148_v57 = vsub.s32 32, %v147_v31 }
  0x25   :  { %v48_v54 = vor.u32 %v47_v48, %v46_v37  ;;  %v51_v55 = vor.u32 %v50_v49, %v49_v39  ;;  %v54_v56 = vor.u32 %v53_v50, %v52_v41  ;;  %vm63_vm5 = vcmp.lt.s32.totalorder %v42_v27, 3 }
  0x26   :  { %v57_v58 = vor.u32 %v56_v51, %v55_v43  ;;  %v60_v59 = vor.u32 %v59_v53, %v58_v45  ;;  %v150_v60 = vshll.u32 %v2822_v36, %v147_v31  ;;  %v153_v12 = vshll.u32 %v2823_v38, %v147_v31 }
  0x27   :  { %v65_v61 = vsel %vm61_vm2, %v45_v47, %v48_v54  ;;  %v66_v62 = vsel %vm64_vm4, %v54_v56, 2102212464  ;;  %v69_v63 = vsel %vm61_vm2, %v48_v54, %v51_v55  ;;  %v73_v7 = vsel %vm61_vm2, %v51_v55, %v54_v56 }
  0x28   :  { %v67_v9 = vsel %vm63_vm5, %v51_v55, %v66_v62  ;;  %v70_v10 = vsel %vm64_vm4, %v57_v58, 920167782  ;;  %v74_v11 = vsel %vm64_vm4, %v60_v59, 1326507024  ;;  %v149_v15 = vshrl.u32 %v2822_v36, %v148_v57 }
  0x29   :  { %v71_v13 = vsel %vm63_vm5, %v54_v56, %v70_v10  ;;  %v75_v14 = vsel %vm63_vm5, %v57_v58, %v74_v11  ;;  %v151_v16 = vshrl.u32 %v2823_v38, %v148_v57  ;;  %v68_v17 = vsel %vm62_vm3, %v65_v61, %v67_v9 }
  0x2a   :  { %v72_v18 = vsel %vm62_vm3, %v69_v63, %v71_v13  ;;  %v76_v19 = vsel %vm62_vm3, %v73_v7, %v75_v14  ;;  %v154_v20 = vshrl.u32 %v2824_v40, %v148_v57  ;;  %v156_v35 = vshll.u32 %v2824_v40, %v147_v31 }
  0x2b   :  { %v2916_v21 = vmul.u32.u64.low %v2880_v29, %v76_v19  ;;  %v2917_v22 = vmul.u32.u64.high %v2880_v29, %v76_v19, %v2916_v21  ;;  %v2920_v24 = vmul.u32.u64.low %v2880_v29, %v72_v18  ;;  %v2921_v25 = vmul.u32.u64.high %v2880_v29, %v72_v18, %v2920_v24 }
  0x2c   :  { %v152_v28 = vor.u32 %v151_v16, %v150_v60  ;;  %v155_v30 = vor.u32 %v154_v20, %v153_v12  ;;  %v157_v37 = vshrl.u32 %v2825_v42, %v148_v57  ;;  %v159_v27 = vshll.u32 %v2825_v42, %v147_v31 }
  0x2d   :  { %v160_v39 = vshrl.u32 %v2826_v44, %v148_v57  ;;  %v162_v41 = vshll.u32 %v2826_v44, %v147_v31  ;;  %v163_v43 = vshrl.u32 %v2827_v52, %v148_v57  ;;  %v84_v45 = vmul.u32 %v2880_v29, %v68_v17 }
  0x2e   :  { %v158_v47 = vor.u32 %v157_v37, %v156_v35  ;;  %vm165_vm7 = vcmp.lt.s32.totalorder %v2895_v46, 1  ;;  %vm166_vm8 = vcmp.lt.s32.totalorder %v2895_v46, 2  ;;  %vm86_vm9 = vc.u32 %v2917_v22, %v2920_v24 }
  0x2f   :  { %v87_v48 = vadd.s32 1, %v2921_v25  ;;  %v161_v49 = vor.u32 %v160_v39, %v159_v27  ;;  %vm167_vm10 = vcmp.lt.s32.totalorder %v2895_v46, 3  ;;  %v164_v50 = vor.u32 %v163_v43, %v162_v41 }
  0x30   :  { %vm168_vm11 = vcmp.lt.s32.totalorder %v2895_v46, 4  ;;  %v169_v31 = vsel %vm165_vm7, %v149_v15, %v152_v28  ;;  %v173_v51 = vsel %vm165_vm7, %v152_v28, %v155_v30  ;;  %v177_v55 = vsel %vm165_vm7, %v155_v30, %v158_v47 }
  0x31   :  { %v88_v29 = vsel %vm86_vm9, %v87_v48, %v2921_v25  ;;  %v170_v53 = vsel %vm168_vm11, %v158_v47, 2102212464  ;;  %v174_v54 = vsel %vm168_vm11, %v161_v49, 920167782  ;;  %v178_v59 = vsel %vm168_vm11, %v164_v50, 1326507024 }
  0x32   :  { %v89_v56 = vadd.s32 %v88_v29, %v84_v45  ;;  %v171_v57 = vsel %vm167_vm10, %v155_v30, %v170_v53  ;;  %v175_v58 = vsel %vm167_vm10, %v158_v47, %v174_v54  ;;  %v179_v62 = vsel %vm167_vm10, %v161_v49, %v178_v59 }
  0x33   :  { %v172_v60 = vsel %vm166_vm8, %v169_v31, %v171_v57  ;;  %v176_v61 = vsel %vm166_vm8, %v173_v51, %v175_v58  ;;  %v249_v63 = vsel %vm248_vm6, %v2888_v34, 0  ;;  %v180_v9 = vsel %vm166_vm8, %v177_v55, %v179_v62 }
  0x34   :  { %v90_v7 = vadd.s32 536870912, %v89_v56  ;;  %v2949_v10 = vmul.u32.u64.low %v2882_v32, %v176_v61  ;;  %v2950_v11 = vmul.u32.u64.high %v2882_v32, %v176_v61, %v2949_v10  ;;  %v245_v15 = vor.u32 8388608, %v2886_v33 }
  0x35   :  { %v2954_v12 = vmul.u32.u64.low %v2882_v32, %v180_v9  ;;  %v2955_v13 = vmul.u32.u64.high %v2882_v32, %v180_v9, %v2954_v12  ;;  %v251_v16 = vand.u32 31, %v249_v63  ;;  %v344_v17 = vand.u32 2139095040, %v2878_v26 }
  0x36   :  { %v91_v14 = vshrl.u32 %v90_v7, 30  ;;  %v188_v34 = vmul.u32 %v2882_v32, %v172_v60  ;;  %v191_v46 = vadd.s32 1, %v2950_v11  ;;  %v2963_v20 = vshrl.u32 %v249_v63, 5 }
  0x37   :  { %v252_v19 = vsub.s32 32, %v251_v16  ;;  %vm190_vm12 = vc.u32 %v2955_v13, %v2949_v10  ;;  %v341_v21 = vand.u32 2147483647, %v2878_v26  ;;  %v2970_v28 = vshll.u32 %v245_v15, 8 }
  0x38   :  { %v92_v18 = vshll.u32 %v91_v14, 30  ;;  %v192_v33 = vsel %vm190_vm12, %v191_v46, %v2950_v11  ;;  %v345_v32 = vshrl.u32 %v344_v17, 23  ;;  %v254_v35 = vshll.u32 %v2822_v36, %v251_v16 }
  0x39   :  { %v193_v30 = vadd.s32 %v192_v33, %v188_v34  ;;  %v255_v37 = vshrl.u32 %v2823_v38, %v252_v19  ;;  %v257_v27 = vshll.u32 %v2823_v38, %v251_v16  ;;  %v258_v41 = vshrl.u32 %v2824_v40, %v252_v19 }
  0x3a   :  { %v2967_v25 = vsub.s32 %v89_v56, %v92_v18  ;;  %v260_v43 = vshll.u32 %v2824_v40, %v251_v16  ;;  %v261_v45 = vshrl.u32 %v2825_v42, %v252_v19  ;;  %v85_v47 = vadd.s32 %v2920_v24, %v2917_v22 }
  0x3b   :  { %v194_v48 = vadd.s32 536870912, %v193_v30  ;;  %v263_v49 = vshll.u32 %v2825_v42, %v251_v16  ;;  %vm269_vm15 = vcmp.lt.s32.totalorder %v2963_v20, 1  ;;  %v115_v31 = vsub.s32 4, %v91_v14 }
  0x3c   :  { %v95_v39 = vsub.s32 0, %v2967_v25  ;;  %v264_v51 = vshrl.u32 %v2826_v44, %v252_v19  ;;  %vm272_vm0 = vcmp.lt.s32.totalorder %v2963_v20, 4  ;;  %v253_v53 = vshrl.u32 %v2822_v36, %v252_v19 }
  0x3d   :  { %v195_v29 = vshrl.u32 %v194_v48, 30  ;;  %v266_v54 = vshll.u32 %v2826_v44, %v251_v16  ;;  %v267_v55 = vshrl.u32 %v2827_v52, %v252_v19  ;;  %vm2998_vm2 = vcmp.le.f32.partialorder %v133_v8, 0.7853982 }
  0x3e   :  { %v2568_v50 = vmin.u32 %v95_v39, %v2967_v25  ;;  %v256_v57 = vor.u32 %v255_v37, %v254_v35  ;;  %v259_v58 = vor.u32 %v258_v41, %v257_v27  ;;  %v262_v59 = vor.u32 %v261_v45, %v260_v43 }
  0x3f   :  { %v196_v60 = vshll.u32 %v195_v29, 30  ;;  %v219_v61 = vsub.s32 4, %v195_v29  ;;  %v265_v62 = vor.u32 %v264_v51, %v263_v49  ;;  %vm270_vm3 = vcmp.lt.s32.totalorder %v2963_v20, 2 }
  0x40   :  { %v97_v24 = vclz %v2568_v50  ;;  %v268_v6 = vor.u32 %v267_v55, %v266_v54  ;;  %vm271_vm4 = vcmp.lt.s32.totalorder %v2963_v20, 3  ;;  %v274_v7 = vsel %vm272_vm0, %v262_v59, 2102212464 }
  0x41   :  { %v116_v8 = vsel %vm31_vm13, %v115_v31, %v91_v14  ;;  %v197_v9 = vsub.s32 %v193_v30, %v196_v60  ;;  %v273_v11 = vsel %vm269_vm15, %v253_v53, %v256_v57  ;;  %v278_v12 = vsel %vm272_vm0, %v265_v62, 920167782 }
  0x42   :  { %v2569_v63 = vadd.s32 4294967294, %v97_v24  ;;  %v220_v15 = vsel %vm135_vm14, %v219_v61, %v195_v29  ;;  %v277_v16 = vsel %vm269_vm15, %v256_v57, %v259_v58  ;;  %v281_v17 = vsel %vm269_vm15, %v259_v58, %v262_v59 }
  0x43   :  { %v199_v18 = vsub.s32 0, %v197_v9  ;;  %v275_v14 = vsel %vm271_vm4, %v259_v58, %v274_v7  ;;  %v279_v46 = vsel %vm271_vm4, %v262_v59, %v278_v12  ;;  %v282_v35 = vsel %vm272_vm0, %v268_v6, 1326507024 }
  0x44   :  { %vm2570_vm5 = vcmp.lt.s32.totalorder %v2569_v63, 0  ;;  %v283_v27 = vsel %vm271_vm4, %v265_v62, %v282_v35  ;;  %v2579_v39 = vadd.s32 4294967169, %v345_v32  ;;  %v348_v41 = vand.u32 8388607, %v341_v21 }
  0x45   :  { %v100_v34 = vsel %vm2570_vm5, 0, %v2569_v63  ;;  %v2572_v37 = vmin.u32 %v199_v18, %v197_v9  ;;  %v280_v48 = vsel %vm270_vm3, %v277_v16, %v279_v46  ;;  %v118_v49 = vsel %vm2992_vm1, 0, %v116_v8 }
  0x46   :  { %v101_v19 = vsub.s32 32, %v100_v34  ;;  %v102_v33 = vshll.u32 %v2967_v25, %v100_v34  ;;  %v105_v30 = vsub.s32 4294967266, %v100_v34  ;;  %v284_v25 = vsel %vm270_vm3, %v281_v17, %v283_v27 }
  0x47   :  { %v201_v50 = vclz %v2572_v37  ;;  %v222_v31 = vsel %vm2998_vm2, 0, %v220_v15  ;;  %v276_v32 = vsel %vm270_vm3, %v273_v11, %v275_v14  ;;  %v351_v57 = vadd.s32 1, %v2579_v39 }
  0x48   :  { %v103_v43 = vshrl.u32 %v85_v47, %v101_v19  ;;  %v106_v45 = vadd.s32 127, %v105_v30  ;;  %v3040_v47 = vmul.u32.u64.low %v2970_v28, %v284_v25  ;;  %v3041_v53 = vmul.u32.u64.high %v2970_v28, %v284_v25, %v3040_v47 }
  0x49   :  { %v2573_v54 = vadd.s32 4294967294, %v201_v50  ;;  %v3044_v55 = vmul.u32.u64.low %v2970_v28, %v280_v48  ;;  %v3045_v24 = vmul.u32.u64.high %v2970_v28, %v280_v48, %v3044_v55  ;;  %v122_v60 = vadd.s32 3, %v118_v49 }
  0x4a   :  { %v104_v51 = vor.u32 %v103_v43, %v102_v33  ;;  %v107_v29 = vshll.u32 %v106_v45, 23  ;;  %v189_v61 = vadd.s32 %v2949_v10, %v2955_v13  ;;  %v226_v20 = vadd.s32 3, %v222_v31 }
  0x4b   :  { %vm2574_vm6 = vcmp.lt.s32.totalorder %v2573_v54, 0  ;;  %v292_v62 = vmul.u32 %v2970_v28, %v276_v32  ;;  %vm352_vm7 = vcmp.gt.s32.totalorder %v351_v57, 0  ;;  %vm294_vm8 = vc.u32 %v3041_v53, %v3044_v55 }
  0x4c   :  { %v108_v58 = vor.u32 4788187, %v107_v29  ;;  %v111_v59 = vcvt.s32.f32 %v104_v51  ;;  %v204_v6 = vsel %vm2574_vm6, 0, %v2573_v54  ;;  %v349_v7 = vor.u32 8388608, %v348_v41 }
  0x4d   :  { %v205_v8 = vsub.s32 32, %v204_v6  ;;  %v206_v11 = vshll.u32 %v197_v9, %v204_v6  ;;  %v209_v12 = vsub.s32 4294967266, %v204_v6  ;;  %v295_v15 = vadd.s32 1, %v3045_v24 }
  0x4e   :  { %v109_v63 = vand.u32 2147483647, %v108_v58  ;;  %v353_v17 = vsel %vm352_vm7, %v351_v57, 0  ;;  %v3054_v13 = vmul.f32 3.1415927, %v2853_v0  ;;  %v3056_v14 = vand.u32 3, %v122_v60 }
  0x4f   :  { %v207_v34 = vshrl.u32 %v189_v61, %v205_v8  ;;  %v210_v18 = vadd.s32 127, %v209_v12  ;;  %v296_v10 = vsel %vm294_vm8, %v295_v15, %v3045_v24  ;;  %v355_v19 = vand.u32 31, %v353_v17 }
  0x50   :  { %v112_v16 = vmul.f32 %v111_v59, %v109_v63  ;;  %v297_v46 = vadd.s32 %v296_v10, %v292_v62  ;;  %v3058_v9 = vand.u32 3, %v226_v20  ;;  %v3060_v35 = vshll.u32 %v349_v7, 8 }
  0x51   :  { %v208_v33 = vor.u32 %v207_v34, %v206_v11  ;;  %v211_v30 = vshll.u32 %v210_v18, 23  ;;  %v356_v39 = vsub.s32 32, %v355_v19  ;;  %v3064_v41 = vand.u32 3, %v118_v49 }
  0x52   :  { %v113_v28 = vxor.u32 2147483648, %v112_v16  ;;  %v298_v27 = vadd.s32 536870912, %v297_v46  ;;  %v3069_v48 = vshrl.u32 %v353_v17, 5  ;;  %v358_v50 = vshll.u32 %v2822_v36, %v355_v19 }
  0x53   :  { %v212_v43 = vor.u32 4788187, %v211_v30  ;;  %v215_v45 = vcvt.s32.f32 %v208_v33  ;;  %v359_v32 = vshrl.u32 %v2823_v38, %v356_v39  ;;  %v361_v49 = vshll.u32 %v2823_v38, %v355_v19 }
  0x54   :  { %v114_v37 = vsel %vm31_vm13, %v113_v28, %v112_v16  ;;  %v3071_v25 = vshrl.u32 %v298_v27, 30  ;;  %v362_v29 = vshrl.u32 %v2824_v40, %v356_v39  ;;  %vm128_vm9 = vcmp.eq.s32.totalorder %v3056_v14, 2 }
  0x55   :  { %v117_v0 = vsel %vm2992_vm1, %v2860_v3, %v114_v37  ;;  %v213_v51 = vand.u32 2147483647, %v212_v43  ;;  %v364_v47 = vshll.u32 %v2824_v40, %v355_v19  ;;  %v365_v54 = vshrl.u32 %v2825_v42, %v356_v39 }
  0x56   :  { %2721 = vcosq.f32 %v117_v0  ;;  %v300_v22 = vshll.u32 %v3071_v25, 30  ;;  %v3081_v24 = vand.u32 3, %v222_v31  ;;  %vm125_vm10 = vcmp.eq.s32.totalorder %v3056_v14, 0 }
  0x57   :  { %2723 = vsinq.f32 %v117_v0  ;;  %v216_v57 = vmul.f32 %v215_v45, %v213_v51  ;;  %v3085_v58 = vadd.s32 %v3044_v55, %v3041_v53  ;;  %v367_v59 = vshll.u32 %v2825_v42, %v355_v19 }
  0x58   :  { %v368_v60 = vshrl.u32 %v2826_v44, %v356_v39  ;;  %vm124_vm11 = vcmp.lt.s32.totalorder %v3056_v14, 2  ;;  %v3090_v61 = vsub.s32 %v297_v46, %v300_v22  ;;  %v360_v20 = vor.u32 %v359_v32, %v358_v50 }
  0x59   :  { %v370_v62 = vshll.u32 %v2826_v44, %v355_v19  ;;  %vm373_vm12 = vcmp.lt.s32.totalorder %v3069_v48, 1  ;;  %vm121_vm13 = vweird.f32 %v2860_v3  ;;  %v217_v31 = vxor.u32 2147483648, %v216_v57 }
  0x5a   :  { %v363_v63 = vor.u32 %v362_v29, %v361_v49  ;;  %v369_v6 = vor.u32 %v368_v60, %v367_v59  ;;  %v371_v53 = vshrl.u32 %v2827_v52, %v356_v39  ;;  %v303_v55 = vsub.s32 0, %v3090_v61 }
  0x5b   :  { %v357_v7 = vshrl.u32 %v2822_v36, %v356_v39  ;;  %v366_v8 = vor.u32 %v365_v54, %v364_v47  ;;  %vm376_vm15 = vcmp.lt.s32.totalorder %v3069_v48, 4  ;;  %v218_v11 = vsel %vm135_vm14, %v217_v31, %v216_v57 }
  0x5c   :  { %vm375_vm0 = vcmp.lt.s32.totalorder %v3069_v48, 3  ;;  %vm543_vm1 = vcmp.lt.s32.totalorder %v3064_v41, 2  ;;  %vm544_vm3 = vcmp.eq.s32.totalorder %v3064_v41, 0  ;;  %vm547_vm4 = vcmp.eq.s32.totalorder %v3064_v41, 2 }
  0x5d   :  { %v221_v12 = vsel %vm2998_vm2, %v2863_v4, %v218_v11  ;;  %v2576_v15 = vmin.u32 %v303_v55, %v3090_v61  ;;  %v372_v16 = vor.u32 %v371_v53, %v370_v62  ;;  %v378_v17 = vsel %vm376_vm15, %v366_v8, 2102212464 }
  0x5e   :  { %2725 = vcosq.f32 %v221_v12  ;;  %vm374_vm14 = vcmp.lt.s32.totalorder %v3069_v48, 2  ;;  %v381_v34 = vsel %vm373_vm12, %v360_v20, %v363_v63  ;;  %v382_v18 = vsel %vm376_vm15, %v369_v6, 920167782 }
  0x5f   :  { %2727 = vsinq.f32 %v221_v12  ;;  %v305_v28 = vclz %v2576_v15  ;;  %v323_v56 = vsub.s32 4, %v3071_v25  ;;  %v377_v46 = vsel %vm373_vm12, %v357_v7, %v360_v20 }
  0x60   :  { %v2722_v10 = vpop.eup %2721  ;;  %v379_v30 = vsel %vm375_vm0, %v363_v63, %v378_v17  ;;  %v383_v37 = vsel %vm375_vm0, %v366_v8, %v382_v18  ;;  %v385_v27 = vsel %vm373_vm12, %v363_v63, %v366_v8  ;;  %vm229_vm2 = vcmp.eq.s32.totalorder %v3058_v9, 0 }
  0x61   :  { %v2724_v19 = vpop.eup %2723  ;;  %v129_v33 = vxor.u32 2147483648, %v2722_v10  ;;  %vm239_vm5 = vcmp.lt.s32.totalorder %v2866_v5, 0  ;;  %v2577_v0 = vadd.s32 4294967294, %v305_v28  ;;  %v384_v43 = vsel %vm374_vm14, %v381_v34, %v383_v37 }
  0x62   :  { %v126_v39 = vxor.u32 2147483648, %v2724_v19  ;;  %v386_v45 = vsel %vm376_vm15, %v372_v16, 1326507024  ;;  %vm228_vm6 = vcmp.lt.s32.totalorder %v3058_v9, 2  ;;  %vm225_vm7 = vweird.f32 %v2863_v4 }
  0x63   :  { %v130_v50 = vsel %vm128_vm9, %v129_v33, %v2724_v19  ;;  %v387_v32 = vsel %vm375_vm0, %v369_v6, %v386_v45  ;;  %v3137_v51 = vmul.u32.u64.low %v3060_v35, %v384_v43  ;;  %v3138_v49 = vmul.u32.u64.high %v3060_v35, %v384_v43, %v3137_v51 }
  0x64   :  { %v127_v29 = vsel %vm125_vm10, %v2722_v10, %v126_v39  ;;  %vm2578_vm8 = vcmp.lt.s32.totalorder %v2577_v0, 0  ;;  %v380_v22 = vsel %vm374_vm14, %v377_v46, %v379_v30  ;;  %v388_v47 = vsel %vm374_vm14, %v385_v27, %v387_v32 }
  0x65   :  { %v131_v54 = vsel %vm124_vm11, %v127_v29, %v130_v50  ;;  %v308_v57 = vsel %vm2578_vm8, 0, %v2577_v0  ;;  %v3151_v59 = vmul.u32.u64.low %v3060_v35, %v388_v47  ;;  %v3152_v60 = vmul.u32.u64.high %v3060_v35, %v388_v47, %v3151_v59 }
  0x66   :  { %v132_v20 = vsel %vm121_vm13, nan, %v131_v54  ;;  %v309_v62 = vsub.s32 32, %v308_v57  ;;  %v310_v31 = vshll.u32 %v3090_v61, %v308_v57  ;;  %v313_v63 = vsub.s32 4294967266, %v308_v57 }
  0x67   :  { %445 = vst [vmem:[#allocation5] sm:$0xff] %v132_v20  ;;  %v396_v6 = vmul.u32 %v3060_v35, %v380_v22  ;;  %v399_v48 = vadd.s32 1, %v3138_v49  ;;  %v546_v14 = vsel %vm544_vm3, %v2722_v10, %v126_v39  ;;  %v549_v53 = vsel %vm547_vm4, %v129_v33, %v2724_v19 }
  0x68   :  { %vm232_vm9 = vcmp.eq.s32.totalorder %v3058_v9, 2  ;;  %v311_v55 = vshrl.u32 %v3085_v58, %v309_v62  ;;  %v314_v7 = vadd.s32 127, %v313_v63  ;;  %v550_v61 = vsel %vm543_vm1, %v546_v14, %v549_v53  ;;  %v2726_v8 = vpop.eup %2725 }
  0x69   :  { %vm398_vm10 = vc.u32 %v3152_v60, %v3137_v51  ;;  %v551_v35 = vsel %vm121_vm13, nan, %v550_v61  ;;  %vm647_vm11 = vcmp.eq.s32.totalorder %v3081_v24, 0  ;;  %vm650_vm12 = vcmp.eq.s32.totalorder %v3081_v24, 2  ;;  %v2728_v11 = vpop.eup %2727 }
  0x6a   :  { %v233_v12 = vxor.u32 2147483648, %v2726_v8  ;;  %v312_v15 = vor.u32 %v311_v55, %v310_v31  ;;  %v315_v16 = vshll.u32 %v314_v7, 23  ;;  %v400_v58 = vsel %vm398_vm10, %v399_v48, %v3138_v49  ;;  %862 = vst [vmem:[#allocation5 + $0x20] sm:$0xff] %v551_v35 }
  0x6b   :  { %v230_v41 = vxor.u32 2147483648, %v2728_v11  ;;  %v324_v17 = vsel %vm239_vm5, %v323_v56, %v3071_v25  ;;  %v401_v34 = vadd.s32 %v400_v58, %v396_v6  ;;  %vm646_vm15 = vcmp.lt.s32.totalorder %v3081_v24, 2 }
  0x6c   :  { %v234_v3 = vsel %vm232_vm9, %v233_v12, %v2728_v11  ;;  %v316_v18 = vor.u32 4788187, %v315_v16  ;;  %v319_v10 = vcvt.s32.f32 %v312_v15  ;;  %v652_v28 = vsel %vm650_vm12, %v233_v12, %v2728_v11 }
  0x6d   :  { %v231_v46 = vsel %vm229_vm2, %v2726_v8, %v230_v41  ;;  %vm3184_vm13 = vcmp.le.f32.partialorder %v237_v23, 0.7853982  ;;  %v402_v33 = vadd.s32 536870912, %v401_v34  ;;  %v649_v25 = vsel %vm647_vm11, %v2726_v8, %v230_v41 }
  0x6e   :  { %v235_v56 = vsel %vm228_vm6, %v231_v46, %v234_v3  ;;  %v317_v30 = vand.u32 2147483647, %v316_v18  ;;  %v326_v37 = vsel %vm3184_vm13, 0, %v324_v17  ;;  %v653_v27 = vsel %vm646_vm15, %v649_v25, %v652_v28 }
  0x6f   :  { %v236_v39 = vsel %vm225_vm7, nan, %v235_v56  ;;  %v403_v0 = vshrl.u32 %v402_v33, 30  ;;  %v654_v23 = vsel %vm225_vm7, nan, %v653_v27  ;;  %v3199_v43 = vmul.f32 3.1415927, %v2855_v1 }
  0x70   :  { %446 = vst [vmem:[#allocation5 + $0x8] sm:$0xff] %v236_v39  ;;  %v320_v24 = vmul.f32 %v319_v10, %v317_v30  ;;  %863 = vst [vmem:[#allocation5 + $0x28] sm:$0xff] %v654_v23  ;;  %v870_v9 = vand.u32 2147483647, %v3054_v13  ;;  %v873_v45 = vand.u32 2139095040, %v3054_v13  ;;  %v330_v50 = vadd.s32 3, %v326_v37 }
  0x71   :  { %v404_v32 = vshll.u32 %v403_v0, 30  ;;  %v427_v29 = vsub.s32 4, %v403_v0  ;;  %v977_v4 = vand.u32 2139095040, %v3199_v43  ;;  %vm343_vm0 = vcmp.lt.s32.totalorder %v2878_v26, 0 }
  0x72   :  { %v321_v49 = vxor.u32 2147483648, %v320_v24  ;;  %v874_v22 = vshrl.u32 %v873_v45, 23  ;;  %v877_v57 = vand.u32 8388607, %v870_v9  ;;  %v3214_v20 = vand.u32 3, %v330_v50 }
  0x73   :  { %v3203_v47 = vsub.s32 %v401_v34, %v404_v32  ;;  %v3217_v31 = vand.u32 3, %v326_v37  ;;  %v428_v63 = vsel %vm343_vm0, %v427_v29, %v403_v0  ;;  %v978_v48 = vshrl.u32 %v977_v4, 23 }
  0x74   :  { %v322_v1 = vsel %vm239_vm5, %v321_v49, %v320_v24  ;;  %v2599_v54 = vadd.s32 4294967169, %v874_v22  ;;  %vm3224_vm1 = vcmp.le.f32.partialorder %v341_v21, 0.7853982  ;;  %v878_v55 = vor.u32 8388608, %v877_v57 }
  0x75   :  { %v325_v59 = vsel %vm3184_vm13, %v2866_v5, %v322_v1  ;;  %v407_v62 = vsub.s32 0, %v3203_v47  ;;  %v2603_v7 = vadd.s32 4294967169, %v978_v48  ;;  %vm333_vm4 = vcmp.eq.s32.totalorder %v3214_v20, 0 }
  0x76   :  { %2729 = vcosq.f32 %v325_v59  ;;  %v880_v6 = vadd.s32 1, %v2599_v54  ;;  %vm336_vm14 = vcmp.eq.s32.totalorder %v3214_v20, 2  ;;  %v3232_v8 = vsel %vm3224_vm1, 0, %v428_v63 }
  0x77   :  { %2731 = vsinq.f32 %v325_v59  ;;  %v2580_v14 = vmin.u32 %v407_v62, %v3203_v47  ;;  %vm332_vm2 = vcmp.lt.s32.totalorder %v3214_v20, 2  ;;  %v397_v21 = vadd.s32 %v3137_v51, %v3152_v60 }
  0x78   :  { %vm881_vm3 = vcmp.gt.s32.totalorder %v880_v6, 0  ;;  %vm749_vm5 = vcmp.lt.s32.totalorder %v3217_v31, 2  ;;  %vm750_vm6 = vcmp.eq.s32.totalorder %v3217_v31, 0  ;;  %vm329_vm7 = vweird.f32 %v2866_v5 }
  0x79   :  { %v409_v61 = vclz %v2580_v14  ;;  %v882_v35 = vsel %vm881_vm3, %v880_v6, 0  ;;  %vm753_vm8 = vcmp.eq.s32.totalorder %v3217_v31, 2  ;;  %v3241_v15 = vadd.s32 1, %v2603_v7 }
  0x7a   :  { %v884_v12 = vand.u32 31, %v882_v35  ;;  %v3244_v16 = vadd.s32 3, %v3232_v8  ;;  %v3246_v58 = vshrl.u32 %v882_v35, 5  ;;  %v3248_v41 = vshll.u32 %v878_v55, 8 }
  0x7b   :  { %v2581_v11 = vadd.s32 4294967294, %v409_v61  ;;  %v974_v51 = vand.u32 2147483647, %v3199_v43  ;;  %vm985_vm10 = vcmp.gt.s32.totalorder %v3241_v15, 0 }
  0x7c   :  { %v885_v60 = vsub.s32 32, %v884_v12  ;;  %v887_v17 = vshll.u32 %v2822_v36, %v884_v12  ;;  %v890_v34 = vshll.u32 %v2823_v38, %v884_v12  ;;  %v893_v18 = vshll.u32 %v2824_v40, %v884_v12 }
  0x7d   :  { %vm2582_vm9 = vcmp.lt.s32.totalorder %v2581_v11, 0  ;;  %v896_v10 = vshll.u32 %v2825_v42, %v884_v12  ;;  %v899_v28 = vshll.u32 %v2826_v44, %v884_v12  ;;  %vm902_vm11 = vcmp.lt.s32.totalorder %v3246_v58, 1 }
  0x7e   :  { %v412_v3 = vsel %vm2582_vm9, 0, %v2581_v11  ;;  %v886_v25 = vshrl.u32 %v2822_v36, %v885_v60  ;;  %v888_v30 = vshrl.u32 %v2823_v38, %v885_v60  ;;  %v891_v37 = vshrl.u32 %v2824_v40, %v885_v60 }
  0x7f   :  { %v413_v46 = vsub.s32 32, %v412_v3  ;;  %v414_v19 = vshll.u32 %v3203_v47, %v412_v3  ;;  %v417_v33 = vsub.s32 4294967266, %v412_v3  ;;  %v894_v27 = vshrl.u32 %v2825_v42, %v885_v60 }
  0x80   :  { %v2730_v56 = vpop.eup %2729  ;;  %v897_v39 = vshrl.u32 %v2826_v44, %v885_v60  ;;  %v900_v50 = vshrl.u32 %v2827_v52, %v885_v60  ;;  %v889_v49 = vor.u32 %v888_v30, %v887_v17  ;;  %v892_v29 = vor.u32 %v891_v37, %v890_v34 }
  0x81   :  { %v2732_v0 = vpop.eup %2731  ;;  %v337_v23 = vxor.u32 2147483648, %v2730_v56  ;;  %v415_v24 = vshrl.u32 %v397_v21, %v413_v46  ;;  %v418_v45 = vadd.s32 127, %v417_v33  ;;  %v895_v22 = vor.u32 %v894_v27, %v893_v18 }
  0x82   :  { %v334_v32 = vxor.u32 2147483648, %v2732_v0  ;;  %v898_v62 = vor.u32 %v897_v39, %v896_v10  ;;  %v901_v63 = vor.u32 %v900_v50, %v899_v28  ;;  %vm903_vm12 = vcmp.lt.s32.totalorder %v3246_v58, 2 }
  0x83   :  { %v338_v47 = vsel %vm336_vm14, %v337_v23, %v2732_v0  ;;  %v416_v4 = vor.u32 %v415_v24, %v414_v19  ;;  %v419_v1 = vshll.u32 %v418_v45, 23  ;;  %v755_v54 = vsel %vm753_vm8, %v337_v23, %v2732_v0 }
  0x84   :  { %v335_v57 = vsel %vm333_vm4, %v2730_v56, %v334_v32  ;;  %v752_v59 = vsel %vm750_vm6, %v2730_v56, %v334_v32  ;;  %vm904_vm15 = vcmp.lt.s32.totalorder %v3246_v58, 3  ;;  %vm905_vm13 = vcmp.lt.s32.totalorder %v3246_v58, 4 }
  0x85   :  { %v339_v6 = vsel %vm332_vm2, %v335_v57, %v338_v47  ;;  %v420_v48 = vor.u32 4788187, %v419_v1  ;;  %v423_v14 = vcvt.s32.f32 %v416_v4  ;;  %v756_v55 = vsel %vm749_vm5, %v752_v59, %v755_v54 }
  0x86   :  { %v340_v7 = vsel %vm329_vm7, nan, %v339_v6  ;;  %v757_v61 = vsel %vm329_vm7, nan, %v756_v55  ;;  %v906_v20 = vsel %vm902_vm11, %v886_v25, %v889_v49  ;;  %v907_v31 = vsel %vm905_vm13, %v895_v22, 2102212464 }
  0x87   :  { %447 = vst [vmem:[#allocation5 + $0x10] sm:$0xff] %v340_v7  ;;  %v421_v21 = vand.u32 2147483647, %v420_v48  ;;  %864 = vst [vmem:[#allocation5 + $0x30] sm:$0xff] %v757_v61  ;;  %v910_v35 = vsel %vm902_vm11, %v889_v49, %v892_v29  ;;  %v911_v11 = vsel %vm905_vm13, %v898_v62, 920167782  ;;  %v914_v12 = vsel %vm902_vm11, %v892_v29, %v895_v22 }
  0x88   :  { %v908_v17 = vsel %vm904_vm15, %v892_v29, %v907_v31  ;;  %v912_v5 = vsel %vm904_vm15, %v895_v22, %v911_v11  ;;  %v915_v34 = vsel %vm905_vm13, %v901_v63, 1326507024  ;;  %v986_v28 = vsel %vm985_vm10, %v3241_v15, 0 }
  0x89   :  { %v424_v60 = vmul.f32 %v423_v14, %v421_v21  ;;  %v909_v3 = vsel %vm903_vm12, %v906_v20, %v908_v17  ;;  %v913_v18 = vsel %vm903_vm12, %v910_v35, %v912_v5  ;;  %v916_v10 = vsel %vm904_vm15, %v898_v62, %v915_v34 }
  0x8a   :  { %v917_v19 = vsel %vm903_vm12, %v914_v12, %v916_v10  ;;  %v3294_v33 = vmul.u32.u64.low %v3248_v41, %v913_v18  ;;  %v3295_v25 = vmul.u32.u64.high %v3248_v41, %v913_v18, %v3294_v33  ;;  %v3305_v27 = vand.u32 3, %v3232_v8 }
  0x8b   :  { %v425_v46 = vxor.u32 2147483648, %v424_v60  ;;  %v3299_v56 = vmul.u32.u64.low %v3248_v41, %v917_v19  ;;  %v3300_v30 = vmul.u32.u64.high %v3248_v41, %v917_v19, %v3299_v56  ;;  %v981_v15 = vand.u32 8388607, %v974_v51 }
  0x8c   :  { %v988_v58 = vand.u32 31, %v986_v28  ;;  %v3313_v0 = vand.u32 3, %v3244_v16  ;;  %v925_v23 = vmul.u32 %v3248_v41, %v909_v3  ;;  %v3317_v24 = vmul.f32 3.1415927, %v2857_v2 }
  0x8d   :  { %v426_v37 = vsel %vm343_vm0, %v425_v46, %v424_v60  ;;  %v928_v8 = vadd.s32 1, %v3295_v25  ;;  %vm927_vm0 = vc.u32 %v3300_v30, %v3294_v33  ;;  %v3323_v53 = vshrl.u32 %v986_v28, 5 }
  0x8e   :  { %v429_v39 = vsel %vm3224_vm1, %v2878_v26, %v426_v37  ;;  %v989_v45 = vsub.s32 32, %v988_v58  ;;  %v991_v50 = vshll.u32 %v2822_v36, %v988_v58  ;;  %v994_v16 = vshll.u32 %v2823_v38, %v988_v58 }
  0x8f   :  { %2733 = vcosq.f32 %v429_v39  ;;  %vm856_vm1 = vcmp.eq.s32.totalorder %v3305_v27, 2  ;;  %v929_v41 = vsel %vm927_vm0, %v928_v8, %v3295_v25  ;;  %v982_v2 = vor.u32 8388608, %v981_v15 }
  0x90   :  { %2735 = vsinq.f32 %v429_v39  ;;  %v992_v32 = vshrl.u32 %v2823_v38, %v989_v45  ;;  %v995_v49 = vshrl.u32 %v2824_v40, %v989_v45  ;;  %vm853_vm3 = vcmp.eq.s32.totalorder %v3305_v27, 0 }
  0x91   :  { %v930_v29 = vadd.s32 %v929_v41, %v925_v23  ;;  %v997_v22 = vshll.u32 %v2824_v40, %v988_v58  ;;  %v998_v47 = vshrl.u32 %v2825_v42, %v989_v45  ;;  %v1000_v4 = vshll.u32 %v2825_v42, %v988_v58 }
  0x92   :  { %vm436_vm4 = vcmp.lt.s32.totalorder %v3313_v0, 2  ;;  %vm852_vm14 = vcmp.lt.s32.totalorder %v3305_v27, 2  ;;  %v993_v1 = vor.u32 %v992_v32, %v991_v50  ;;  %v996_v54 = vor.u32 %v995_v49, %v994_v16 }
  0x93   :  { %v1001_v57 = vshrl.u32 %v2826_v44, %v989_v45  ;;  %v1003_v59 = vshll.u32 %v2826_v44, %v988_v58  ;;  %vm433_vm2 = vweird.f32 %v2878_v26  ;;  %v931_v62 = vadd.s32 536870912, %v930_v29 }
  0x94   :  { %v999_v63 = vor.u32 %v998_v47, %v997_v22  ;;  %v1004_v6 = vshrl.u32 %v2827_v52, %v989_v45  ;;  %vm1009_vm5 = vcmp.lt.s32.totalorder %v3323_v53, 4  ;;  %v990_v48 = vshrl.u32 %v2822_v36, %v989_v45 }
  0x95   :  { %v1002_v14 = vor.u32 %v1001_v57, %v1000_v4  ;;  %vm1006_vm6 = vcmp.lt.s32.totalorder %v3323_v53, 1  ;;  %vm1008_vm7 = vcmp.lt.s32.totalorder %v3323_v53, 3  ;;  %vm437_vm8 = vcmp.eq.s32.totalorder %v3313_v0, 0 }
  0x96   :  { %vm440_vm9 = vcmp.eq.s32.totalorder %v3313_v0, 2  ;;  %v932_v55 = vshrl.u32 %v931_v62, 30  ;;  %v1005_v7 = vor.u32 %v1004_v6, %v1003_v59  ;;  %vm1007_vm10 = vcmp.lt.s32.totalorder %v3323_v53, 2 }
  0x97   :  { %v1011_v61 = vsel %vm1009_vm5, %v999_v63, 2102212464  ;;  %v1015_v21 = vsel %vm1009_vm5, %v1002_v14, 920167782  ;;  %v1081_v20 = vand.u32 2139095040, %v3317_v24  ;;  %v1014_v35 = vsel %vm1006_vm6, %v993_v1, %v996_v54 }
  0x98   :  { %v933_v31 = vshll.u32 %v932_v55, 30  ;;  %v1016_v11 = vsel %vm1008_vm7, %v999_v63, %v1015_v21  ;;  %v1018_v12 = vsel %vm1006_vm6, %v996_v54, %v999_v63  ;;  %v1010_v17 = vsel %vm1006_vm6, %v990_v48, %v993_v1  ;;  %v3402_v48 = vld [vmem:[#allocation2 + $0x18] sm:$0xff] }
  0x99   :  { %v2734_v60 = vpop.eup %2733  ;;  %v1019_v5 = vsel %vm1009_vm5, %v1005_v7, 1326507024  ;;  %v1022_v34 = vshll.u32 %v982_v2, 8  ;;  %v1082_v3 = vshrl.u32 %v1081_v20, 23  ;;  %v1012_v46 = vsel %vm1008_vm7, %v996_v54, %v1011_v61 }
  0x9a   :  { %v2736_v18 = vpop.eup %2735  ;;  %v441_v10 = vxor.u32 2147483648, %v2734_v60  ;;  %v934_v28 = vsub.s32 %v930_v29, %v933_v31  ;;  %v1020_v19 = vsel %vm1008_vm7, %v1002_v14, %v1019_v5  ;;  %v956_v56 = vsub.s32 4, %v932_v55 }
  0x9b   :  { %v438_v25 = vxor.u32 2147483648, %v2736_v18  ;;  %v1017_v37 = vsel %vm1007_vm10, %v1014_v35, %v1016_v11  ;;  %v1021_v15 = vsel %vm1007_vm10, %v1018_v12, %v1020_v19  ;;  %v2607_v8 = vadd.s32 4294967169, %v1082_v3 }
  0x9c   :  { %v442_v58 = vsel %vm440_vm9, %v441_v10, %v2736_v18  ;;  %v858_v39 = vsel %vm856_vm1, %v441_v10, %v2736_v18  ;;  %v936_v23 = vsub.s32 0, %v934_v28  ;;  %v1013_v29 = vsel %vm1007_vm10, %v1010_v17, %v1012_v46 }
  0x9d   :  { %v439_v45 = vsel %vm437_vm8, %v2734_v60, %v438_v25  ;;  %v855_v50 = vsel %vm853_vm3, %v2734_v60, %v438_v25  ;;  %v3372_v16 = vmul.u32.u64.low %v1022_v34, %v1021_v15  ;;  %v3373_v41 = vmul.u32.u64.high %v1022_v34, %v1021_v15, %v3372_v16 }
  0x9e   :  { %v443_v2 = vsel %vm436_vm4, %v439_v45, %v442_v58  ;;  %v859_v32 = vsel %vm852_vm14, %v855_v50, %v858_v39  ;;  %v2600_v49 = vmin.u32 %v936_v23, %v934_v28  ;;  %vm872_vm11 = vcmp.lt.s32.totalorder %v3054_v13, 0 }
  0x9f   :  { %v444_v22 = vsel %vm433_vm2, nan, %v443_v2  ;;  %v860_v47 = vsel %vm433_vm2, nan, %v859_v32  ;;  %v3385_v4 = vmul.u32.u64.low %v1022_v34, %v1017_v37  ;;  %v3386_v1 = vmul.u32.u64.high %v1022_v34, %v1017_v37, %v3385_v4 }
  0xa0   :  { %448 = vst [vmem:[#allocation5 + $0x18] sm:$0xff] %v444_v22  ;;  %865 = vst [vmem:[#allocation5 + $0x38] sm:$0xff] %v860_v47  ;;  %v938_v0 = vclz %v2600_v49  ;;  %v1088_v27 = vadd.s32 1, %v2607_v8  ;;  %v957_v53 = vsel %vm872_vm11, %v956_v56, %v932_v55  ;;  %v1029_v57 = vmul.u32 %v1022_v34, %v1013_v29 }
  0xa1   :  { %vm1031_vm12 = vc.u32 %v3373_v41, %v3385_v4  ;;  %vm3394_vm15 = vcmp.le.f32.partialorder %v870_v9, 0.7853982  ;;  %v1032_v59 = vadd.s32 1, %v3386_v1  ;;  %v1078_v62 = vand.u32 2147483647, %v3317_v24 }
  0xa2   :  { %v2601_v54 = vadd.s32 4294967294, %v938_v0  ;;  %vm1089_vm13 = vcmp.gt.s32.totalorder %v1088_v27, 0  ;;  %v926_v63 = vadd.s32 %v3294_v33, %v3300_v30  ;;  %v3405_v14 = vmul.f32 3.1415927, %v3402_v48 }
  0xa3   :  { %v1090_v6 = vsel %vm1089_vm13, %v1088_v27, 0  ;;  %v3409_v9 = vsel %vm3394_vm15, 0, %v957_v53  ;;  %v1033_v7 = vsel %vm1031_vm12, %v1032_v59, %v3386_v1  ;;  %v1085_v33 = vand.u32 8388607, %v1078_v62 }
  0xa4   :  { %vm2602_vm0 = vcmp.lt.s32.totalorder %v2601_v54, 0  ;;  %v1092_v61 = vand.u32 31, %v1090_v6  ;;  %v1034_v35 = vadd.s32 %v1033_v7, %v1029_v57  ;;  %v963_v37 = vadd.s32 3, %v3409_v9 }
  0xa5   :  { %v941_v55 = vsel %vm2602_vm0, 0, %v2601_v54  ;;  %v3424_v15 = vadd.s32 %v3385_v4, %v3373_v41  ;;  %v1091_v58 = vshrl.u32 %v1090_v6, 5  ;;  %v1182_v50 = vand.u32 2147483647, %v3405_v14 }
  0xa6   :  { %v942_v21 = vsub.s32 32, %v941_v55  ;;  %v943_v20 = vshll.u32 %v934_v28, %v941_v55  ;;  %v946_v31 = vsub.s32 4294967266, %v941_v55  ;;  %v1093_v30 = vsub.s32 32, %v1092_v61 }
  0xa7   :  { %v1095_v11 = vshll.u32 %v2822_v36, %v1092_v61  ;;  %v1098_v12 = vshll.u32 %v2823_v38, %v1092_v61  ;;  %v1035_v5 = vadd.s32 536870912, %v1034_v35  ;;  %v1101_v34 = vshll.u32 %v2824_v40, %v1092_v61 }
  0xa8   :  { %v944_v60 = vshrl.u32 %v926_v63, %v942_v21  ;;  %v947_v17 = vadd.s32 127, %v946_v31  ;;  %v1096_v3 = vshrl.u32 %v2823_v38, %v1093_v30  ;;  %v1099_v18 = vshrl.u32 %v2824_v40, %v1093_v30 }
  0xa9   :  { %v1102_v10 = vshrl.u32 %v2825_v42, %v1093_v30  ;;  %v1104_v28 = vshll.u32 %v2825_v42, %v1092_v61  ;;  %v1036_v25 = vshrl.u32 %v1035_v5, 30  ;;  %v1105_v56 = vshrl.u32 %v2826_v44, %v1093_v30 }
  0xaa   :  { %v945_v46 = vor.u32 %v944_v60, %v943_v20  ;;  %v948_v19 = vshll.u32 %v947_v17, 23  ;;  %v1107_v39 = vshll.u32 %v2826_v44, %v1092_v61  ;;  %vm976_vm1 = vcmp.lt.s32.totalorder %v3199_v43, 0 }
  0xab   :  { %v1037_v45 = vshll.u32 %v1036_v25, 30  ;;  %v1086_v16 = vor.u32 8388608, %v1085_v33  ;;  %v1097_v2 = vor.u32 %v1096_v3, %v1095_v11  ;;  %v1106_v32 = vor.u32 %v1105_v56, %v1104_v28 }
  0xac   :  { %v949_v23 = vor.u32 4788187, %v948_v19  ;;  %v952_v8 = vcvt.s32.f32 %v945_v46  ;;  %v1108_v49 = vshrl.u32 %v2827_v52, %v1093_v30  ;;  %v1100_v41 = vor.u32 %v1099_v18, %v1098_v12 }
  0xad   :  { %v3430_v22 = vsub.s32 %v1034_v35, %v1037_v45  ;;  %v1103_v47 = vor.u32 %v1102_v10, %v1101_v34  ;;  %vm1110_vm3 = vcmp.lt.s32.totalorder %v1091_v58, 1  ;;  %vm1113_vm4 = vcmp.lt.s32.totalorder %v1091_v58, 4 }
  0xae   :  { %v950_v29 = vand.u32 2147483647, %v949_v23  ;;  %v1109_v4 = vor.u32 %v1108_v49, %v1107_v39  ;;  %v1185_v1 = vand.u32 2139095040, %v3405_v14  ;;  %v1094_v54 = vshrl.u32 %v2822_v36, %v1093_v30 }
  0xaf   :  { %v1040_v27 = vsub.s32 0, %v3430_v22  ;;  %vm1112_vm14 = vcmp.lt.s32.totalorder %v1091_v58, 3  ;;  %v1060_v53 = vsub.s32 4, %v1036_v25  ;;  %vm1111_vm2 = vcmp.lt.s32.totalorder %v1091_v58, 2 }
  0xb0   :  { %v953_v0 = vmul.f32 %v952_v8, %v950_v29  ;;  %v1115_v57 = vsel %vm1113_vm4, %v1103_v47, 2102212464  ;;  %v1119_v59 = vsel %vm1113_vm4, %v1106_v32, 920167782  ;;  %v1118_v55 = vsel %vm1110_vm3, %v1097_v2, %v1100_v41 }
  0xb1   :  { %v2604_v6 = vmin.u32 %v1040_v27, %v3430_v22  ;;  %v1122_v7 = vsel %vm1110_vm3, %v1100_v41, %v1103_v47  ;;  %v1120_v61 = vsel %vm1112_vm14, %v1103_v47, %v1119_v59  ;;  %v1123_v21 = vsel %vm1113_vm4, %v1109_v4, 1326507024  ;;  %v2770_v47 = vld [vmem:[#allocation2] sm:$0xff] }
  0xb2   :  { %v954_v63 = vxor.u32 2147483648, %v953_v0  ;;  %v1126_v20 = vshll.u32 %v1086_v16, 8  ;;  %v1186_v31 = vshrl.u32 %v1185_v1, 23  ;;  %v1114_v30 = vsel %vm1110_vm3, %v1094_v54, %v1097_v2 }
  0xb3   :  { %v1042_v33 = vclz %v2604_v6  ;;  %v1189_v11 = vand.u32 8388607, %v1182_v50  ;;  %v1116_v60 = vsel %vm1112_vm14, %v1100_v41, %v1115_v57  ;;  %v1121_v17 = vsel %vm1111_vm2, %v1118_v55, %v1120_v61 }
  0xb4   :  { %v955_v35 = vsel %vm872_vm11, %v954_v63, %v953_v0  ;;  %v1124_v5 = vsel %vm1112_vm14, %v1106_v32, %v1123_v21  ;;  %v1061_v3 = vsel %vm976_vm1, %v1060_v53, %v1036_v25  ;;  %v2611_v46 = vadd.s32 4294967169, %v1186_v31 }
  0xb5   :  { %v958_v12 = vsel %vm3394_vm15, %v3054_v13, %v955_v35  ;;  %v2605_v34 = vadd.s32 4294967294, %v1042_v33  ;;  %v1125_v18 = vsel %vm1111_vm2, %v1122_v7, %v1124_v5  ;;  %v1117_v26 = vsel %vm1111_vm2, %v1114_v30, %v1116_v60 }
  0xb6   :  { %2737 = vcosq.f32 %v958_v12  ;;  %v3453_v10 = vmul.u32.u64.low %v1126_v20, %v1125_v18  ;;  %v3454_v28 = vmul.u32.u64.high %v1126_v20, %v1125_v18, %v3453_v10  ;;  %v964_v39 = vand.u32 3, %v963_v37 }
  0xb7   :  { %2739 = vsinq.f32 %v958_v12  ;;  %vm2606_vm5 = vcmp.lt.s32.totalorder %v2605_v34, 0  ;;  %v3457_v19 = vmul.u32.u64.low %v1126_v20, %v1121_v17  ;;  %v3458_v56 = vmul.u32.u64.high %v1126_v20, %v1121_v17, %v3457_v19 }
  0xb8   :  { %vm3463_vm6 = vcmp.le.f32.partialorder %v974_v51, 0.7853982  ;;  %v1045_v25 = vsel %vm2606_vm5, 0, %v2605_v34  ;;  %v1192_v8 = vadd.s32 1, %v2611_v46  ;;  %vm962_vm7 = vweird.f32 %v3054_v13 }
  0xb9   :  { %v1046_v45 = vsub.s32 32, %v1045_v25  ;;  %v1047_v16 = vshll.u32 %v3430_v22, %v1045_v25  ;;  %v1050_v2 = vsub.s32 4294967266, %v1045_v25  ;;  %v3470_v58 = vsel %vm3463_vm6, 0, %v1061_v3 }
  0xba   :  { %v1133_v32 = vmul.u32 %v1126_v20, %v1117_v26  ;;  %vm1135_vm8 = vc.u32 %v3454_v28, %v3457_v19  ;;  %v1190_v51 = vor.u32 8388608, %v1189_v11  ;;  %vm1193_vm9 = vcmp.gt.s32.totalorder %v1192_v8, 0 }
  0xbb   :  { %v1048_v37 = vshrl.u32 %v3424_v15, %v1046_v45  ;;  %v1051_v49 = vadd.s32 127, %v1050_v2  ;;  %v1136_v29 = vadd.s32 1, %v3458_v56  ;;  %v1194_v41 = vsel %vm1193_vm9, %v1192_v8, 0 }
  0xbc   :  { %vm965_vm10 = vcmp.lt.s32.totalorder %v964_v39, 2  ;;  %vm966_vm11 = vcmp.eq.s32.totalorder %v964_v39, 0  ;;  %v1196_v22 = vand.u32 31, %v1194_v41  ;;  %v3477_v4 = vmul.f32 12.566371, %v2770_v47 }
  0xbd   :  { %vm969_vm12 = vcmp.eq.s32.totalorder %v964_v39, 2  ;;  %v1049_v1 = vor.u32 %v1048_v37, %v1047_v16  ;;  %v1052_v0 = vshll.u32 %v1051_v49, 23  ;;  %v1137_v27 = vsel %vm1135_vm8, %v1136_v29, %v3458_v56 }
  0xbe   :  { %v1067_v54 = vadd.s32 3, %v3470_v58  ;;  %v1138_v53 = vadd.s32 %v1137_v27, %v1133_v32  ;;  %v1197_v57 = vsub.s32 32, %v1196_v22  ;;  %v3482_v15 = vand.u32 3, %v3409_v9 }
  0xbf   :  { %v1053_v63 = vor.u32 4788187, %v1052_v0  ;;  %v1056_v6 = vcvt.s32.f32 %v1049_v1  ;;  %v3486_v55 = vshrl.u32 %v1194_v41, 5  ;;  %v3488_v7 = vshll.u32 %v1190_v51, 8 }
  0xc0   :  { %v3484_v59 = vpop.eup %2737  ;;  %v1139_v20 = vadd.s32 536870912, %v1138_v53  ;;  %v1199_v31 = vshll.u32 %v2822_v36, %v1196_v22  ;;  %v1202_v35 = vshll.u32 %v2823_v38, %v1196_v22  ;;  %v1205_v30 = vshll.u32 %v2824_v40, %v1196_v22 }
  0xc1   :  { %v3490_v61 = vpop.eup %2739  ;;  %v970_v21 = vxor.u32 2147483648, %v3484_v59  ;;  %v1054_v33 = vand.u32 2147483647, %v1053_v63  ;;  %v1208_v11 = vshll.u32 %v2825_v42, %v1196_v22  ;;  %v1200_v17 = vshrl.u32 %v2823_v38, %v1197_v57 }
  0xc2   :  { %v967_v9 = vxor.u32 2147483648, %v3490_v61  ;;  %v3502_v60 = vshrl.u32 %v1139_v20, 30  ;;  %v1203_v5 = vshrl.u32 %v2824_v40, %v1197_v57  ;;  %v1206_v18 = vshrl.u32 %v2825_v42, %v1197_v57 }
  0xc3   :  { %v971_v12 = vsel %vm969_vm12, %v970_v21, %v3490_v61  ;;  %v1057_v3 = vmul.f32 %v1056_v6, %v1054_v33  ;;  %v1209_v10 = vshrl.u32 %v2826_v44, %v1197_v57  ;;  %vm1386_vm15 = vcmp.eq.s32.totalorder %v3482_v15, 0 }
  0xc4   :  { %v968_v34 = vsel %vm966_vm11, %v3484_v59, %v967_v9  ;;  %v1141_v26 = vshll.u32 %v3502_v60, 30  ;;  %vm1389_vm13 = vcmp.eq.s32.totalorder %v3482_v15, 2  ;;  %v1211_v8 = vshll.u32 %v2826_v44, %v1196_v22 }
  0xc5   :  { %v972_v46 = vsel %vm965_vm10, %v968_v34, %v971_v12  ;;  %v1058_v25 = vxor.u32 2147483648, %v1057_v3  ;;  %v1212_v45 = vshrl.u32 %v2827_v52, %v1197_v57  ;;  %v1198_v39 = vshrl.u32 %v2822_v36, %v1197_v57 }
  0xc6   :  { %v973_v56 = vsel %vm962_vm7, nan, %v972_v46  ;;  %v3518_v16 = vsub.s32 %v1138_v53, %v1141_v26  ;;  %v1201_v2 = vor.u32 %v1200_v17, %v1199_v31  ;;  %v1204_v32 = vor.u32 %v1203_v5, %v1202_v35 }
  0xc7   :  { %1287 = vst [vmem:[#allocation5 + $0x40] sm:$0xff] %v973_v56  ;;  %v1059_v51 = vsel %vm976_vm1, %v1058_v25, %v1057_v3  ;;  %v1207_v37 = vor.u32 %v1206_v18, %v1205_v30  ;;  %v1210_v49 = vor.u32 %v1209_v10, %v1208_v11  ;;  %v1213_v29 = vor.u32 %v1212_v45, %v1211_v8 }
  0xc8   :  { %v1062_v41 = vsel %vm3463_vm6, %v3199_v43, %v1059_v51  ;;  %v1144_v22 = vsub.s32 0, %v3518_v16  ;;  %vm1214_vm0 = vcmp.lt.s32.totalorder %v3486_v55, 1  ;;  %vm1217_vm3 = vcmp.lt.s32.totalorder %v3486_v55, 4 }
  0xc9   :  { %2741 = vcosq.f32 %v1062_v41  ;;  %vm1215_vm4 = vcmp.lt.s32.totalorder %v3486_v55, 2  ;;  %vm1216_vm14 = vcmp.lt.s32.totalorder %v3486_v55, 3  ;;  %v1219_v47 = vsel %vm1217_vm3, %v1207_v37, 2102212464 }
  0xca   :  { %2743 = vsinq.f32 %v1062_v41  ;;  %v2608_v1 = vmin.u32 %v1144_v22, %v3518_v16  ;;  %v1218_v0 = vsel %vm1214_vm0, %v1198_v39, %v1201_v2  ;;  %v1220_v23 = vsel %vm1216_vm14, %v1204_v32, %v1219_v47 }
  0xcb   :  { %v1222_v27 = vsel %vm1214_vm0, %v1201_v2, %v1204_v32  ;;  %v1223_v53 = vsel %vm1217_vm3, %v1210_v49, 920167782  ;;  %v1226_v57 = vsel %vm1214_vm0, %v1204_v32, %v1207_v37  ;;  %v1227_v63 = vsel %vm1217_vm3, %v1213_v29, 1326507024 }
  0xcc   :  { %v1068_v6 = vand.u32 3, %v1067_v54  ;;  %vm1080_vm1 = vcmp.lt.s32.totalorder %v3317_v24, 0  ;;  %v1146_v20 = vclz %v2608_v1  ;;  %vm1385_vm2 = vcmp.lt.s32.totalorder %v3482_v15, 2 }
  0xcd   :  { %v1487_v31 = vand.u32 3, %v3470_v58  ;;  %v1221_v35 = vsel %vm1215_vm4, %v1218_v0, %v1220_v23  ;;  %v1224_v33 = vsel %vm1216_vm14, %v1207_v37, %v1223_v53  ;;  %v1228_v30 = vsel %vm1216_vm14, %v1210_v49, %v1227_v63 }
  0xce   :  { %v1388_v54 = vsel %vm1386_vm15, %v3484_v59, %v967_v9  ;;  %vm1066_vm5 = vweird.f32 %v3199_v43  ;;  %v2609_v11 = vadd.s32 4294967294, %v1146_v20  ;;  %v1225_v12 = vsel %vm1215_vm4, %v1222_v27, %v1224_v33 }
  0xcf   :  { %v1229_v58 = vsel %vm1215_vm4, %v1226_v57, %v1228_v30  ;;  %v1391_v17 = vsel %vm1389_vm13, %v970_v21, %v3490_v61  ;;  %v3561_v9 = vmul.u32.u64.low %v3488_v7, %v1225_v12  ;;  %v3562_v3 = vmul.u32.u64.high %v3488_v7, %v1225_v12, %v3561_v9 }
  0xd0   :  { %v3557_v5 = vmul.u32.u64.low %v3488_v7, %v1229_v58  ;;  %v3558_v34 = vmul.u32.u64.high %v3488_v7, %v1229_v58, %v3557_v5  ;;  %vm1069_vm6 = vcmp.lt.s32.totalorder %v1068_v6, 2  ;;  %v1134_v55 = vadd.s32 %v3457_v19, %v3454_v28 }
  0xd1   :  { %vm2610_vm8 = vcmp.lt.s32.totalorder %v2609_v11, 0  ;;  %v1392_v59 = vsel %vm1385_vm2, %v1388_v54, %v1391_v17  ;;  %vm1070_vm9 = vcmp.eq.s32.totalorder %v1068_v6, 0  ;;  %v1164_v61 = vsub.s32 4, %v3502_v60 }
  0xd2   :  { %v1149_v18 = vsel %vm2610_vm8, 0, %v2609_v11  ;;  %v1393_v21 = vsel %vm962_vm7, nan, %v1392_v59  ;;  %v1237_v56 = vmul.u32 %v3488_v7, %v1221_v35  ;;  %vm1073_vm10 = vcmp.eq.s32.totalorder %v1068_v6, 2 }
  0xd3   :  { %v1150_v10 = vsub.s32 32, %v1149_v18  ;;  %v1151_v46 = vshll.u32 %v3518_v16, %v1149_v18  ;;  %v1154_v26 = vsub.s32 4294967266, %v1149_v18  ;;  %1704 = vst [vmem:[#allocation5 + $0x60] sm:$0xff] %v1393_v21  ;;  %v2742_v25 = vpop.eup %2741  ;;  %vm1239_vm11 = vc.u32 %v3558_v34, %v3561_v9 }
  0xd4   :  { %v1240_v28 = vadd.s32 1, %v3562_v3  ;;  %vm1489_vm12 = vcmp.eq.s32.totalorder %v1487_v31, 0  ;;  %v2744_v19 = vpop.eup %2743  ;;  %v1074_v15 = vxor.u32 2147483648, %v2742_v25  ;;  %vm1492_vm7 = vcmp.eq.s32.totalorder %v1487_v31, 2 }
  0xd5   :  { %v1152_v8 = vshrl.u32 %v1134_v55, %v1150_v10  ;;  %v1155_v13 = vadd.s32 127, %v1154_v26  ;;  %v1071_v45 = vxor.u32 2147483648, %v2744_v19  ;;  %v1165_v16 = vsel %vm1080_vm1, %v1164_v61, %v3502_v60 }
  0xd6   :  { %v1241_v7 = vsel %vm1239_vm11, %v1240_v28, %v3562_v3  ;;  %vm1488_vm15 = vcmp.lt.s32.totalorder %v1487_v31, 2  ;;  %v1075_v39 = vsel %vm1073_vm10, %v1074_v15, %v2744_v19  ;;  %vm3584_vm13 = vcmp.le.f32.partialorder %v1078_v62, 0.7853982  ;;  %v2771_v31 = vld [vmem:[#allocation2 + $0x8] sm:$0xff] }
  0xd7   :  { %v1153_v2 = vor.u32 %v1152_v8, %v1151_v46  ;;  %v1156_v32 = vshll.u32 %v1155_v13, 23  ;;  %v1242_v51 = vadd.s32 %v1241_v7, %v1237_v56  ;;  %v1072_v37 = vsel %vm1070_vm9, %v2742_v25, %v1071_v45 }
  0xd8   :  { %v1491_v29 = vsel %vm1489_vm12, %v2742_v25, %v1071_v45  ;;  %v1494_v41 = vsel %vm1492_vm7, %v1074_v15, %v2744_v19  ;;  %v1076_v60 = vsel %vm1069_vm6, %v1072_v37, %v1075_v39  ;;  %v1167_v23 = vsel %vm3584_vm13, 0, %v1165_v16  ;;  %v2772_v45 = vld [vmem:[#allocation2 + $0x10] sm:$0xff] }
  0xd9   :  { %v1157_v22 = vor.u32 4788187, %v1156_v32  ;;  %v1160_v47 = vcvt.s32.f32 %v1153_v2  ;;  %v1243_v1 = vadd.s32 536870912, %v1242_v51  ;;  %v1077_v0 = vsel %vm1066_vm5, nan, %v1076_v60 }
  0xda   :  { %v1495_v27 = vsel %vm1488_vm15, %v1491_v29, %v1494_v41  ;;  %v1715_v62 = vand.u32 2139095040, %v3477_v4  ;;  %1288 = vst [vmem:[#allocation5 + $0x48] sm:$0xff] %v1077_v0  ;;  %v1712_v6 = vand.u32 2147483647, %v3477_v4  ;;  %v3598_v35 = vmul.f32 12.566371, %v2771_v31 }
  0xdb   :  { %v1158_v53 = vand.u32 2147483647, %v1157_v22  ;;  %v1244_v57 = vshrl.u32 %v1243_v1, 30  ;;  %v1496_v63 = vsel %vm1066_vm5, nan, %v1495_v27  ;;  %v1171_v30 = vadd.s32 3, %v1167_v23 }
  0xdc   :  { %1705 = vst [vmem:[#allocation5 + $0x68] sm:$0xff] %v1496_v63  ;;  %v1716_v20 = vshrl.u32 %v1715_v62, 23  ;;  %v1719_v17 = vand.u32 8388607, %v1712_v6  ;;  %v1819_v3 = vand.u32 2139095040, %v3598_v35  ;;  %v3613_v21 = vand.u32 3, %v1167_v23 }
  0xdd   :  { %v1161_v33 = vmul.f32 %v1160_v47, %v1158_v53  ;;  %v1245_v54 = vshll.u32 %v1244_v57, 30  ;;  %v1268_v5 = vsub.s32 4, %v1244_v57  ;;  %v3607_v59 = vand.u32 3, %v1171_v30 }
  0xde   :  { %v2631_v11 = vadd.s32 4294967169, %v1716_v20  ;;  %vm1184_vm3 = vcmp.lt.s32.totalorder %v3405_v14, 0  ;;  %v1720_v46 = vor.u32 8388608, %v1719_v17  ;;  %v1820_v25 = vshrl.u32 %v1819_v3, 23 }
  0xdf   :  { %v1162_v12 = vxor.u32 2147483648, %v1161_v33  ;;  %v3600_v58 = vsub.s32 %v1242_v51, %v1245_v54  ;;  %v1269_v26 = vsel %vm1184_vm3, %v1268_v5, %v1244_v57  ;;  %vm1177_vm4 = vcmp.eq.s32.totalorder %v3607_v59, 2 }
  0xe0   :  { %v1722_v43 = vadd.s32 1, %v2631_v11  ;;  %vm3622_vm14 = vcmp.le.f32.partialorder %v1182_v50, 0.7853982  ;;  %v1238_v19 = vadd.s32 %v3561_v9, %v3558_v34  ;;  %vm1592_vm2 = vcmp.eq.s32.totalorder %v3613_v21, 0 }
  0xe1   :  { %v1163_v55 = vsel %vm1080_vm1, %v1162_v12, %v1161_v33  ;;  %v1248_v18 = vsub.s32 0, %v3600_v58  ;;  %vm1174_vm1 = vcmp.eq.s32.totalorder %v3607_v59, 0  ;;  %vm1595_vm5 = vcmp.eq.s32.totalorder %v3613_v21, 2 }
  0xe2   :  { %v1166_v61 = vsel %vm3584_vm13, %v3317_v24, %v1163_v55  ;;  %vm1723_vm0 = vcmp.gt.s32.totalorder %v1722_v43, 0  ;;  %v3633_v16 = vmul.f32 12.566371, %v2772_v45  ;;  %vm1173_vm6 = vcmp.lt.s32.totalorder %v3607_v59, 2 }
  0xe3   :  { %2745 = vcosq.f32 %v1166_v61  ;;  %v2612_v10 = vmin.u32 %v1248_v18, %v3600_v58  ;;  %v1724_v56 = vsel %vm1723_vm0, %v1722_v43, 0  ;;  %v3638_v7 = vsel %vm3622_vm14, 0, %v1269_v26 }
  0xe4   :  { %2747 = vsinq.f32 %v1166_v61  ;;  %v3631_v8 = vshrl.u32 %v1724_v56, 5  ;;  %v1726_v13 = vand.u32 31, %v1724_v56  ;;  %vm1591_vm8 = vcmp.lt.s32.totalorder %v3613_v21, 2 }
  0xe5   :  { %v1250_v15 = vclz %v2612_v10  ;;  %v3641_v34 = vshll.u32 %v1720_v46, 8  ;;  %v1816_v9 = vand.u32 2147483647, %v3598_v35  ;;  %vm1170_vm9 = vweird.f32 %v3317_v24 }
  0xe6   :  { %v1727_v39 = vsub.s32 32, %v1726_v13  ;;  %v1729_v2 = vshll.u32 %v2822_v36, %v1726_v13  ;;  %v1732_v32 = vshll.u32 %v2823_v38, %v1726_v13  ;;  %v2635_v51 = vadd.s32 4294967169, %v1820_v25 }
  0xe7   :  { %v2613_v50 = vadd.s32 4294967294, %v1250_v15  ;;  %v1735_v37 = vshll.u32 %v2824_v40, %v1726_v13  ;;  %v1738_v49 = vshll.u32 %v2825_v42, %v1726_v13  ;;  %v1741_v29 = vshll.u32 %v2826_v44, %v1726_v13 }
  0xe8   :  { %v1730_v60 = vshrl.u32 %v2823_v38, %v1727_v39  ;;  %v1733_v22 = vshrl.u32 %v2824_v40, %v1727_v39  ;;  %vm1744_vm11 = vcmp.lt.s32.totalorder %v3631_v8, 1  ;;  %v1736_v23 = vshrl.u32 %v2825_v42, %v1727_v39 }
  0xe9   :  { %vm2614_vm10 = vcmp.lt.s32.totalorder %v2613_v50, 0  ;;  %v1728_v27 = vshrl.u32 %v2822_v36, %v1727_v39  ;;  %v1739_v53 = vshrl.u32 %v2826_v44, %v1727_v39  ;;  %v1742_v57 = vshrl.u32 %v2827_v52, %v1727_v39 }
  0xea   :  { %v1253_v41 = vsel %vm2614_vm10, 0, %v2613_v50  ;;  %v1731_v62 = vor.u32 %v1730_v60, %v1729_v2  ;;  %v1734_v33 = vor.u32 %v1733_v22, %v1732_v32  ;;  %v1737_v30 = vor.u32 %v1736_v23, %v1735_v37 }
  0xeb   :  { %v1254_v47 = vsub.s32 32, %v1253_v41  ;;  %v1255_v1 = vshll.u32 %v3600_v58, %v1253_v41  ;;  %v1258_v0 = vsub.s32 4294967266, %v1253_v41  ;;  %v1740_v12 = vor.u32 %v1739_v53, %v1738_v49 }
  0xec   :  { %v1743_v17 = vor.u32 %v1742_v57, %v1741_v29  ;;  %vm1745_vm12 = vcmp.lt.s32.totalorder %v3631_v8, 2  ;;  %vm1747_vm7 = vcmp.lt.s32.totalorder %v3631_v8, 4  ;;  %vm1746_vm15 = vcmp.lt.s32.totalorder %v3631_v8, 3 }
  0xed   :  { %v2746_v63 = vpop.eup %2745  ;;  %v1256_v20 = vshrl.u32 %v1238_v19, %v1254_v47  ;;  %v1259_v31 = vadd.s32 127, %v1258_v0  ;;  %v1749_v18 = vsel %vm1747_vm7, %v1737_v30, 2102212464  ;;  %v1748_v19 = vsel %vm1744_vm11, %v1728_v27, %v1731_v62 }
  0xee   :  { %v2748_v54 = vpop.eup %2747  ;;  %v1178_v11 = vxor.u32 2147483648, %v2746_v63  ;;  %v1750_v15 = vsel %vm1746_vm15, %v1734_v33, %v1749_v18  ;;  %v1752_v59 = vsel %vm1744_vm11, %v1731_v62, %v1734_v33  ;;  %v1753_v21 = vsel %vm1747_vm7, %v1740_v12, 920167782 }
  0xef   :  { %v1175_v58 = vxor.u32 2147483648, %v2748_v54  ;;  %v1257_v5 = vor.u32 %v1256_v20, %v1255_v1  ;;  %v1260_v43 = vshll.u32 %v1259_v31, 23  ;;  %v1756_v39 = vsel %vm1744_vm11, %v1734_v33, %v1737_v30 }
  0xf0   :  { %v1179_v3 = vsel %vm1177_vm4, %v1178_v11, %v2748_v54  ;;  %v1597_v55 = vsel %vm1595_vm5, %v1178_v11, %v2748_v54  ;;  %v1757_v2 = vsel %vm1747_vm7, %v1743_v17, 1326507024  ;;  %v3693_v32 = vand.u32 8388607, %v1816_v9 }
  0xf1   :  { %v1176_v61 = vsel %vm1174_vm1, %v2746_v63, %v1175_v58  ;;  %v1261_v10 = vor.u32 4788187, %v1260_v43  ;;  %v1264_v46 = vcvt.s32.f32 %v1257_v5  ;;  %v1594_v26 = vsel %vm1592_vm2, %v2746_v63, %v1175_v58 }
  0xf2   :  { %v1180_v56 = vsel %vm1173_vm6, %v1176_v61, %v1179_v3  ;;  %v1598_v25 = vsel %vm1591_vm8, %v1594_v26, %v1597_v55  ;;  %v1754_v37 = vsel %vm1746_vm15, %v1737_v30, %v1753_v21  ;;  %v1758_v49 = vsel %vm1746_vm15, %v1740_v12, %v1757_v2 }
  0xf3   :  { %v1181_v13 = vsel %vm1170_vm9, nan, %v1180_v56  ;;  %v1262_v45 = vand.u32 2147483647, %v1261_v10  ;;  %v1599_v50 = vsel %vm1170_vm9, nan, %v1598_v25  ;;  %v1826_v29 = vadd.s32 1, %v2635_v51 }
  0xf4   :  { %1289 = vst [vmem:[#allocation5 + $0x50] sm:$0xff] %v1181_v13  ;;  %1706 = vst [vmem:[#allocation5 + $0x70] sm:$0xff] %v1599_v50  ;;  %v1275_v41 = vadd.s32 3, %v3638_v7  ;;  %v1751_v60 = vsel %vm1745_vm12, %v1748_v19, %v1750_v15  ;;  %v1755_v22 = vsel %vm1745_vm12, %v1752_v59, %v1754_v37  ;;  %v1759_v47 = vsel %vm1745_vm12, %v1756_v39, %v1758_v49 }
  0xf5   :  { %v1265_v24 = vmul.f32 %v1264_v46, %v1262_v45  ;;  %v3707_v0 = vmul.u32.u64.low %v3641_v34, %v1759_v47  ;;  %v3708_v23 = vmul.u32.u64.high %v3641_v34, %v1759_v47, %v3707_v0  ;;  %vm1827_vm13 = vcmp.gt.s32.totalorder %v1826_v29, 0 }
  0xf6   :  { %v3711_v27 = vmul.u32.u64.low %v3641_v34, %v1755_v22  ;;  %v3712_v51 = vmul.u32.u64.high %v3641_v34, %v1755_v22, %v3711_v27  ;;  %v1828_v62 = vsel %vm1827_vm13, %v1826_v29, 0  ;;  %v3718_v57 = vand.u32 3, %v3638_v7 }
  0xf7   :  { %v1266_v1 = vxor.u32 2147483648, %v1265_v24  ;;  %v1830_v8 = vand.u32 31, %v1828_v62  ;;  %v1923_v63 = vand.u32 2139095040, %v3633_v16  ;;  %v3724_v31 = vand.u32 3, %v1275_v41 }
  0xf8   :  { %v1767_v33 = vmul.u32 %v3641_v34, %v1751_v60  ;;  %v1824_v30 = vor.u32 8388608, %v3693_v32  ;;  %vm1769_vm0 = vc.u32 %v3708_v23, %v3711_v27  ;;  %v3730_v54 = vshrl.u32 %v1828_v62, 5 }
  0xf9   :  { %v1267_v53 = vsel %vm1184_vm3, %v1266_v1, %v1265_v24  ;;  %v1831_v7 = vsub.s32 32, %v1830_v8  ;;  %v1770_v11 = vadd.s32 1, %v3712_v51  ;;  %v1833_v12 = vshll.u32 %v2822_v36, %v1830_v8 }
  0xfa   :  { %v1270_v20 = vsel %vm3622_vm14, %v3405_v14, %v1267_v53  ;;  %v1836_v28 = vshll.u32 %v2823_v38, %v1830_v8  ;;  %vm1698_vm3 = vcmp.eq.s32.totalorder %v3718_v57, 2  ;;  %v1839_v58 = vshll.u32 %v2824_v40, %v1830_v8 }
  0xfb   :  { %2749 = vcosq.f32 %v1270_v20  ;;  %v1834_v34 = vshrl.u32 %v2823_v38, %v1831_v7  ;;  %v1837_v17 = vshrl.u32 %v2824_v40, %v1831_v7  ;;  %v1924_v5 = vshrl.u32 %v1923_v63, 23 }
  0xfc   :  { %2751 = vsinq.f32 %v1270_v20  ;;  %vm1278_vm4 = vcmp.eq.s32.totalorder %v3724_v31, 0  ;;  %vm1695_vm14 = vcmp.eq.s32.totalorder %v3718_v57, 0  ;;  %v1771_v43 = vsel %vm1769_vm0, %v1770_v11, %v3712_v51 }
  0xfd   :  { %v1840_v3 = vshrl.u32 %v2825_v42, %v1831_v7  ;;  %v1842_v55 = vshll.u32 %v2825_v42, %v1830_v8  ;;  %v1843_v18 = vshrl.u32 %v2826_v44, %v1831_v7  ;;  %vm1277_vm1 = vcmp.lt.s32.totalorder %v3724_v31, 2 }
  0xfe   :  { %vm1694_vm2 = vcmp.lt.s32.totalorder %v3718_v57, 2  ;;  %v1772_v61 = vadd.s32 %v1771_v43, %v1767_v33  ;;  %v1835_v10 = vor.u32 %v1834_v34, %v1833_v12  ;;  %v1838_v46 = vor.u32 %v1837_v17, %v1836_v28 }
  0xff   :  { %v1845_v26 = vshll.u32 %v2826_v44, %v1830_v8  ;;  %vm1274_vm5 = vweird.f32 %v3405_v14  ;;  %v1841_v56 = vor.u32 %v1840_v3, %v1839_v58  ;;  %v1844_v25 = vor.u32 %v1843_v18, %v1842_v55 }
 0x100   :  { %v1846_v19 = vshrl.u32 %v2827_v52, %v1831_v7  ;;  %vm1848_vm6 = vcmp.lt.s32.totalorder %v3730_v54, 1  ;;  %v1773_v15 = vadd.s32 536870912, %v1772_v61  ;;  %v1832_v13 = vshrl.u32 %v2822_v36, %v1831_v7 }
 0x101   :  { %vm1850_vm8 = vcmp.lt.s32.totalorder %v3730_v54, 3  ;;  %vm1851_vm9 = vcmp.lt.s32.totalorder %v3730_v54, 4  ;;  %vm1714_vm10 = vcmp.lt.s32.totalorder %v3477_v4, 0  ;;  %vm1849_vm11 = vcmp.lt.s32.totalorder %v3730_v54, 2 }
 0x102   :  { %v1847_v45 = vor.u32 %v1846_v19, %v1845_v26  ;;  %v1856_v50 = vsel %vm1848_vm6, %v1835_v10, %v1838_v46  ;;  %v1864_v59 = vshll.u32 %v1824_v30, 8  ;;  %vm1281_vm12 = vcmp.eq.s32.totalorder %v3724_v31, 2 }
 0x103   :  { %v1774_v21 = vshrl.u32 %v1773_v15, 30  ;;  %v1853_v39 = vsel %vm1851_vm9, %v1841_v56, 2102212464  ;;  %v1857_v2 = vsel %vm1851_vm9, %v1844_v25, 920167782  ;;  %v1860_v24 = vsel %vm1848_vm6, %v1838_v46, %v1841_v56 }
 0x104   :  { %v1858_v32 = vsel %vm1850_vm8, %v1841_v56, %v1857_v2  ;;  %v1861_v37 = vsel %vm1851_vm9, %v1847_v45, 1326507024  ;;  %v2639_v49 = vadd.s32 4294967169, %v1924_v5  ;;  %v1852_v60 = vsel %vm1848_vm6, %v1832_v13, %v1835_v10 }
 0x105   :  { %v2750_v29 = vpop.eup %2749  ;;  %v1775_v41 = vshll.u32 %v1774_v21, 30  ;;  %v1859_v22 = vsel %vm1849_vm11, %v1856_v50, %v1858_v32  ;;  %v1862_v47 = vsel %vm1850_vm8, %v1844_v25, %v1861_v37  ;;  %v1854_v51 = vsel %vm1850_vm8, %v1838_v46, %v1853_v39 }
 0x106   :  { %v2752_v1 = vpop.eup %2751  ;;  %v1282_v0 = vxor.u32 2147483648, %v2750_v29  ;;  %v3771_v62 = vmul.u32.u64.low %v1864_v59, %v1859_v22  ;;  %v3772_v53 = vmul.u32.u64.high %v1864_v59, %v1859_v22, %v3771_v62  ;;  %v1798_v20 = vsub.s32 4, %v1774_v21 }
 0x107   :  { %v1279_v8 = vxor.u32 2147483648, %v2752_v1  ;;  %v3774_v63 = vsub.s32 %v1772_v61, %v1775_v41  ;;  %v1863_v33 = vsel %vm1849_vm11, %v1860_v24, %v1862_v47  ;;  %v1920_v11 = vand.u32 2147483647, %v3633_v16 }
 0x108   :  { %v1283_v30 = vsel %vm1281_vm12, %v1282_v0, %v2752_v1  ;;  %v1700_v7 = vsel %vm1698_vm3, %v1282_v0, %v2752_v1  ;;  %v1930_v12 = vadd.s32 1, %v2639_v49  ;;  %v1855_v58 = vsel %vm1849_vm11, %v1852_v60, %v1854_v51 }
 0x109   :  { %v1280_v28 = vsel %vm1278_vm4, %v2750_v29, %v1279_v8  ;;  %v1697_v34 = vsel %vm1695_vm14, %v2750_v29, %v1279_v8  ;;  %v1778_v17 = vsub.s32 0, %v3774_v63  ;;  %v1799_v54 = vsel %vm1714_vm10, %v1798_v20, %v1774_v21 }
 0x10a   :  { %v1284_v5 = vsel %vm1277_vm1, %v1280_v28, %v1283_v30  ;;  %v1701_v43 = vsel %vm1694_vm2, %v1697_v34, %v1700_v7  ;;  %v3794_v3 = vmul.u32.u64.low %v1864_v59, %v1863_v33  ;;  %v3795_v55 = vmul.u32.u64.high %v1864_v59, %v1863_v33, %v3794_v3 }
 0x10b   :  { %v1285_v18 = vsel %vm1274_vm5, nan, %v1284_v5  ;;  %v1702_v61 = vsel %vm1274_vm5, nan, %v1701_v43  ;;  %v2632_v10 = vmin.u32 %v1778_v17, %v3774_v63  ;;  %v1871_v31 = vmul.u32 %v1864_v59, %v1855_v58 }
 0x10c   :  { %1290 = vst [vmem:[#allocation5 + $0x58] sm:$0xff] %v1285_v18  ;;  %1707 = vst [vmem:[#allocation5 + $0x78] sm:$0xff] %v1702_v61  ;;  %v1874_v57 = vadd.s32 1, %v3772_v53  ;;  %v1927_v46 = vand.u32 8388607, %v1920_v11  ;;  %vm1931_vm7 = vcmp.gt.s32.totalorder %v1930_v12, 0  ;;  %vm1873_vm13 = vc.u32 %v3795_v55, %v3771_v62 }
 0x10d   :  { %vm3809_vm15 = vcmp.le.f32.partialorder %v1712_v6, 0.7853982  ;;  %v1780_v14 = vclz %v2632_v10  ;;  %v1932_v25 = vsel %vm1931_vm7, %v1930_v12, 0  ;;  %v3819_v19 = vmul.f32 12.566371, %v3402_v48 }
 0x10e   :  { %v3815_v56 = vsel %vm3809_vm15, 0, %v1799_v54  ;;  %v1875_v13 = vsel %vm1873_vm13, %v1874_v57, %v3772_v53  ;;  %v1934_v45 = vand.u32 31, %v1932_v25  ;;  %v1768_v6 = vadd.s32 %v3711_v27, %v3708_v23 }
 0x10f   :  { %v2633_v15 = vadd.s32 4294967294, %v1780_v14  ;;  %v1876_v50 = vadd.s32 %v1875_v13, %v1871_v31  ;;  %v1928_v59 = vor.u32 8388608, %v1927_v46  ;;  %v2024_v21 = vand.u32 2147483647, %v3819_v19 }
 0x110   :  { %v3826_v39 = vadd.s32 3, %v3815_v56  ;;  %v3828_v2 = vshrl.u32 %v1932_v25, 5  ;;  %v1935_v32 = vsub.s32 32, %v1934_v45  ;;  %v1937_v37 = vshll.u32 %v2822_v36, %v1934_v45 }
 0x111   :  { %vm2634_vm0 = vcmp.lt.s32.totalorder %v2633_v15, 0  ;;  %v1877_v24 = vadd.s32 536870912, %v1876_v50  ;;  %v1940_v49 = vshll.u32 %v2823_v38, %v1934_v45  ;;  %v1943_v41 = vshll.u32 %v2824_v40, %v1934_v45 }
 0x112   :  { %v1783_v48 = vsel %vm2634_vm0, 0, %v2633_v15  ;;  %v1938_v22 = vshrl.u32 %v2823_v38, %v1935_v32  ;;  %v1941_v47 = vshrl.u32 %v2824_v40, %v1935_v32  ;;  %v1946_v1 = vshll.u32 %v2825_v42, %v1934_v45 }
 0x113   :  { %v1784_v29 = vsub.s32 32, %v1783_v48  ;;  %v1785_v23 = vshll.u32 %v3774_v63, %v1783_v48  ;;  %v1788_v27 = vsub.s32 4294967266, %v1783_v48  ;;  %v1878_v60 = vshrl.u32 %v1877_v24, 30 }
 0x114   :  { %vm1818_vm3 = vcmp.lt.s32.totalorder %v3598_v35, 0  ;;  %v1944_v53 = vshrl.u32 %v2825_v42, %v1935_v32  ;;  %v1947_v8 = vshrl.u32 %v2826_v44, %v1935_v32  ;;  %v3841_v63 = vadd.s32 %v3771_v62, %v3795_v55 }
 0x115   :  { %v1786_v0 = vshrl.u32 %v1768_v6, %v1784_v29  ;;  %v1789_v51 = vadd.s32 127, %v1788_v27  ;;  %v1879_v20 = vshll.u32 %v1878_v60, 30  ;;  %v1936_v33 = vshrl.u32 %v2822_v36, %v1935_v32 }
 0x116   :  { %v3844_v30 = vshll.u32 %v1928_v59, 8  ;;  %v1939_v28 = vor.u32 %v1938_v22, %v1937_v37  ;;  %v1949_v34 = vshll.u32 %v2826_v44, %v1934_v45  ;;  %vm3849_vm4 = vcmp.le.f32.partialorder %v1816_v9, 0.7853982 }
 0x117   :  { %v1787_v7 = vor.u32 %v1786_v0, %v1785_v23  ;;  %v1790_v12 = vshll.u32 %v1789_v51, 23  ;;  %v3853_v58 = vsub.s32 %v1876_v50, %v1879_v20  ;;  %v1942_v62 = vor.u32 %v1941_v47, %v1940_v49 }
 0x118   :  { %v1948_v5 = vor.u32 %v1947_v8, %v1946_v1  ;;  %v1950_v43 = vshrl.u32 %v2827_v52, %v1935_v32  ;;  %v1945_v18 = vor.u32 %v1944_v53, %v1943_v41  ;;  %vm1952_vm14 = vcmp.lt.s32.totalorder %v3828_v2, 1 }
 0x119   :  { %v1791_v3 = vor.u32 4788187, %v1790_v12  ;;  %v1794_v55 = vcvt.s32.f32 %v1787_v7  ;;  %v1882_v61 = vsub.s32 0, %v3853_v58  ;;  %v1902_v10 = vsub.s32 4, %v1878_v60 }
 0x11a   :  { %vm1953_vm1 = vcmp.lt.s32.totalorder %v3828_v2, 2  ;;  %vm1954_vm2 = vcmp.lt.s32.totalorder %v3828_v2, 3  ;;  %v1951_v54 = vor.u32 %v1950_v43, %v1949_v34  ;;  %vm1955_vm5 = vcmp.lt.s32.totalorder %v3828_v2, 4 }
 0x11b   :  { %v1792_v9 = vand.u32 2147483647, %v1791_v3  ;;  %v1956_v31 = vsel %vm1952_vm14, %v1936_v33, %v1939_v28  ;;  %v2636_v57 = vmin.u32 %v1882_v61, %v3853_v58  ;;  %v1957_v46 = vsel %vm1955_vm5, %v1945_v18, 2102212464 }
 0x11c   :  { %v1960_v14 = vsel %vm1952_vm14, %v1939_v28, %v1942_v62  ;;  %v1961_v25 = vsel %vm1955_vm5, %v1948_v5, 920167782  ;;  %v1958_v13 = vsel %vm1954_vm2, %v1942_v62, %v1957_v46  ;;  %v2027_v6 = vand.u32 2139095040, %v3819_v19 }
 0x11d   :  { %v1795_v15 = vmul.f32 %v1794_v55, %v1792_v9  ;;  %v1962_v45 = vsel %vm1954_vm2, %v1945_v18, %v1961_v25  ;;  %v1884_v50 = vclz %v2636_v57  ;;  %v1903_v59 = vsel %vm1818_vm3, %v1902_v10, %v1878_v60 }
 0x11e   :  { %v1964_v32 = vsel %vm1952_vm14, %v1942_v62, %v1945_v18  ;;  %v2031_v48 = vand.u32 8388607, %v2024_v21  ;;  %v1959_v37 = vsel %vm1953_vm1, %v1956_v31, %v1958_v13  ;;  %v1963_v49 = vsel %vm1953_vm1, %v1960_v14, %v1962_v45 }
 0x11f   :  { %v1796_v24 = vxor.u32 2147483648, %v1795_v15  ;;  %v1965_v29 = vsel %vm1955_vm5, %v1951_v54, 1326507024  ;;  %v2637_v23 = vadd.s32 4294967294, %v1884_v50  ;;  %v3897_v47 = vsel %vm3849_vm4, 0, %v1903_v59 }
 0x120   :  { %v1966_v27 = vsel %vm1954_vm2, %v1948_v5, %v1965_v29  ;;  %v3890_v41 = vmul.u32.u64.low %v3844_v30, %v1963_v49  ;;  %v3891_v60 = vmul.u32.u64.high %v3844_v30, %v1963_v49, %v3890_v41  ;;  %v2028_v0 = vshrl.u32 %v2027_v6, 23 }
 0x121   :  { %v1797_v22 = vsel %vm1714_vm10, %v1796_v24, %v1795_v15  ;;  %v1967_v1 = vsel %vm1953_vm1, %v1964_v32, %v1966_v27  ;;  %vm2638_vm6 = vcmp.lt.s32.totalorder %v2637_v23, 0  ;;  %v1975_v33 = vmul.u32 %v3844_v30, %v1959_v37 }
 0x122   :  { %v1800_v51 = vsel %vm3809_vm15, %v3477_v4, %v1797_v22  ;;  %v3905_v53 = vmul.u32.u64.low %v3844_v30, %v1967_v1  ;;  %v3906_v8 = vmul.u32.u64.high %v3844_v30, %v1967_v1, %v3905_v53  ;;  %v1887_v20 = vsel %vm2638_vm6, 0, %v2637_v23 }
 0x123   :  { %2753 = vcosq.f32 %v1800_v51  ;;  %v2643_v7 = vadd.s32 4294967169, %v2028_v0  ;;  %v1888_v12 = vsub.s32 32, %v1887_v20  ;;  %v1889_v2 = vshll.u32 %v3853_v58, %v1887_v20 }
 0x124   :  { %2755 = vsinq.f32 %v1800_v51  ;;  %v1892_v28 = vsub.s32 4294967266, %v1887_v20  ;;  %v1806_v34 = vand.u32 3, %v3826_v39  ;;  %v1978_v26 = vadd.s32 1, %v3891_v60 }
 0x125   :  { %v2034_v62 = vadd.s32 1, %v2643_v7  ;;  %v1890_v5 = vshrl.u32 %v3841_v63, %v1888_v12  ;;  %vm1977_vm8 = vc.u32 %v3906_v8, %v3890_v41  ;;  %v1909_v3 = vadd.s32 3, %v3897_v47 }
 0x126   :  { %v1893_v43 = vadd.s32 127, %v1892_v28  ;;  %v1979_v30 = vsel %vm1977_vm8, %v1978_v26, %v3891_v60  ;;  %v2032_v55 = vor.u32 8388608, %v2031_v48  ;;  %vm1804_vm10 = vweird.f32 %v3477_v4 }
 0x127   :  { %vm2035_vm9 = vcmp.gt.s32.totalorder %v2034_v62, 0  ;;  %v1891_v18 = vor.u32 %v1890_v5, %v1889_v2  ;;  %v1980_v58 = vadd.s32 %v1979_v30, %v1975_v33  ;;  %vm1807_vm11 = vcmp.lt.s32.totalorder %v1806_v34, 2 }
 0x128   :  { %v1894_v61 = vshll.u32 %v1893_v43, 23  ;;  %v2036_v10 = vsel %vm2035_vm9, %v2034_v62, 0  ;;  %vm1808_vm12 = vcmp.eq.s32.totalorder %v1806_v34, 0  ;;  %vm1811_vm7 = vcmp.eq.s32.totalorder %v1806_v34, 2 }
 0x129   :  { %v2038_v39 = vand.u32 31, %v2036_v10  ;;  %v1898_v63 = vcvt.s32.f32 %v1891_v18  ;;  %v1981_v54 = vadd.s32 536870912, %v1980_v58  ;;  %v3917_v31 = vand.u32 3, %v1909_v3 }
 0x12a   :  { %v1895_v9 = vor.u32 4788187, %v1894_v61  ;;  %v3919_v46 = vshll.u32 %v2032_v55, 8  ;;  %v3922_v25 = vadd.s32 %v3890_v41, %v3906_v8  ;;  %v3927_v13 = vand.u32 3, %v3815_v56 }
 0x12b   :  { %v2039_v57 = vsub.s32 32, %v2038_v39  ;;  %v3924_v15 = vshrl.u32 %v1981_v54, 30  ;;  %v3931_v6 = vshrl.u32 %v2036_v10, 5  ;;  %v2041_v50 = vshll.u32 %v2822_v36, %v2038_v39 }
 0x12c   :  { %v1896_v14 = vand.u32 2147483647, %v1895_v9  ;;  %v2044_v59 = vshll.u32 %v2823_v38, %v2038_v39  ;;  %v2047_v32 = vshll.u32 %v2824_v40, %v2038_v39  ;;  %v2050_v27 = vshll.u32 %v2825_v42, %v2038_v39 }
 0x12d   :  { %v3929_v45 = vpop.eup %2753  ;;  %v1983_v49 = vshll.u32 %v3924_v15, 30  ;;  %v2042_v29 = vshrl.u32 %v2823_v38, %v2039_v57  ;;  %v2045_v23 = vshrl.u32 %v2824_v40, %v2039_v57  ;;  %v2053_v41 = vshll.u32 %v2826_v44, %v2038_v39 }
 0x12e   :  { %v2756_v48 = vpop.eup %2755  ;;  %v1812_v24 = vxor.u32 2147483648, %v3929_v45  ;;  %v1899_v37 = vmul.f32 %v1898_v63, %v1896_v14  ;;  %v2048_v0 = vshrl.u32 %v2825_v42, %v2039_v57  ;;  %v2040_v53 = vshrl.u32 %v2822_v36, %v2039_v57 }
 0x12f   :  { %v1809_v56 = vxor.u32 2147483648, %v2756_v48  ;;  %v3943_v1 = vsub.s32 %v1980_v58, %v1983_v49  ;;  %v2051_v38 = vshrl.u32 %v2826_v44, %v2039_v57  ;;  %v2054_v40 = vshrl.u32 %v2827_v52, %v2039_v57 }
 0x130   :  { %v1813_v60 = vsel %vm1811_vm7, %v1812_v24, %v2756_v48  ;;  %v1900_v22 = vxor.u32 2147483648, %v1899_v37  ;;  %vm2227_vm15 = vcmp.lt.s32.totalorder %v3927_v13, 2  ;;  %v2043_v7 = vor.u32 %v2042_v29, %v2041_v50 }
 0x131   :  { %v1810_v51 = vsel %vm1808_vm12, %v3929_v45, %v1809_v56  ;;  %v1986_v33 = vsub.s32 0, %v3943_v1  ;;  %v2046_v44 = vor.u32 %v2045_v23, %v2044_v59  ;;  %v2052_v12 = vor.u32 %v2051_v38, %v2050_v27 }
 0x132   :  { %v1814_v8 = vsel %vm1807_vm11, %v1810_v51, %v1813_v60  ;;  %v1901_v20 = vsel %vm1818_vm3, %v1900_v22, %v1899_v37  ;;  %v2049_v2 = vor.u32 %v2048_v0, %v2047_v32  ;;  %vm2056_vm13 = vcmp.lt.s32.totalorder %v3931_v6, 1 }
 0x133   :  { %v1815_v42 = vsel %vm1804_vm10, nan, %v1814_v8  ;;  %v1904_v36 = vsel %vm3849_vm4, %v3598_v35, %v1901_v20  ;;  %v2640_v52 = vmin.u32 %v1986_v33, %v3943_v1  ;;  %v2055_v28 = vor.u32 %v2054_v40, %v2053_v41 }
 0x134   :  { %2129 = vst [vmem:[#allocation5 + $0x80] sm:$0xff] %v1815_v42  ;;  %2757 = vcosq.f32 %v1904_v36  ;;  %vm2058_vm0 = vcmp.lt.s32.totalorder %v3931_v6, 3  ;;  %vm2059_vm3 = vcmp.lt.s32.totalorder %v3931_v6, 4  ;;  %vm2057_vm14 = vcmp.lt.s32.totalorder %v3931_v6, 2 }
 0x135   :  { %2759 = vsinq.f32 %v1904_v36  ;;  %v1988_v34 = vclz %v2640_v52  ;;  %vm2228_vm4 = vcmp.eq.s32.totalorder %v3927_v13, 0  ;;  %vm2231_vm1 = vcmp.eq.s32.totalorder %v3927_v13, 2 }
 0x136   :  { %v2060_v17 = vsel %vm2056_vm13, %v2040_v53, %v2043_v7  ;;  %v2061_v26 = vsel %vm2059_vm3, %v2049_v2, 2102212464  ;;  %v2064_v62 = vsel %vm2056_vm13, %v2043_v7, %v2046_v44  ;;  %v2065_v5 = vsel %vm2059_vm3, %v2052_v12, 920167782 }
 0x137   :  { %v2641_v43 = vadd.s32 4294967294, %v1988_v34  ;;  %v2062_v3 = vsel %vm2058_vm0, %v2046_v44, %v2061_v26  ;;  %v2066_v30 = vsel %vm2058_vm0, %v2049_v2, %v2065_v5  ;;  %v2068_v55 = vsel %vm2056_vm13, %v2046_v44, %v2049_v2 }
 0x138   :  { %vm1908_vm2 = vweird.f32 %v3598_v35  ;;  %v2067_v18 = vsel %vm2057_vm14, %v2064_v62, %v2066_v30  ;;  %v2069_v61 = vsel %vm2059_vm3, %v2055_v28, 1326507024  ;;  %v2230_v58 = vsel %vm2228_vm4, %v3929_v45, %v1809_v56 }
 0x139   :  { %v2329_v10 = vand.u32 3, %v3897_v47  ;;  %vm2642_vm5 = vcmp.lt.s32.totalorder %v2641_v43, 0  ;;  %v2070_v39 = vsel %vm2058_vm0, %v2052_v12, %v2069_v61  ;;  %v2063_v57 = vsel %vm2057_vm14, %v2060_v17, %v2062_v3 }
 0x13a   :  { %v3986_v9 = vmul.u32.u64.low %v3919_v46, %v2067_v18  ;;  %v3987_v63 = vmul.u32.u64.high %v3919_v46, %v2067_v18, %v3986_v9  ;;  %v1991_v54 = vsel %vm2642_vm5, 0, %v2641_v43  ;;  %v2071_v14 = vsel %vm2057_vm14, %v2068_v55, %v2070_v39 }
 0x13b   :  { %v2233_v45 = vsel %vm2231_vm1, %v1812_v24, %v2756_v48  ;;  %v1992_v47 = vsub.s32 32, %v1991_v54  ;;  %v1993_v50 = vshll.u32 %v3943_v1, %v1991_v54  ;;  %v1996_v59 = vsub.s32 4294967266, %v1991_v54 }
 0x13c   :  { %v2234_v32 = vsel %vm2227_vm15, %v2230_v58, %v2233_v45  ;;  %vm1911_vm6 = vcmp.lt.s32.totalorder %v3917_v31, 2  ;;  %v4001_v37 = vmul.u32.u64.low %v3919_v46, %v2071_v14  ;;  %v4002_v49 = vmul.u32.u64.high %v3919_v46, %v2071_v14, %v4001_v37 }
 0x13d   :  { %v2235_v6 = vsel %vm1804_vm10, nan, %v2234_v32  ;;  %vm1915_vm8 = vcmp.eq.s32.totalorder %v3917_v31, 2  ;;  %v1994_v48 = vshrl.u32 %v3922_v25, %v1992_v47  ;;  %v1997_v24 = vadd.s32 127, %v1996_v59 }
 0x13e   :  { %v2758_v29 = vpop.eup %2757  ;;  %v2082_v56 = vadd.s32 1, %v3987_v63  ;;  %2546 = vst [vmem:[#allocation5 + $0xa0] sm:$0xff] %v2235_v6  ;;  %vm1912_vm9 = vcmp.eq.s32.totalorder %v3917_v31, 0  ;;  %v2079_v27 = vmul.u32 %v3919_v46, %v2063_v57  ;;  %vm2334_vm11 = vcmp.eq.s32.totalorder %v2329_v10, 2 }
 0x13f   :  { %v2760_v13 = vpop.eup %2759  ;;  %v1916_v23 = vxor.u32 2147483648, %v2758_v29  ;;  %v1995_v60 = vor.u32 %v1994_v48, %v1993_v50  ;;  %v1998_v4 = vshll.u32 %v1997_v24, 23  ;;  %vm2331_vm10 = vcmp.eq.s32.totalorder %v2329_v10, 0 }
 0x140   :  { %v1913_v41 = vxor.u32 2147483648, %v2760_v13  ;;  %vm2081_vm12 = vc.u32 %v4002_v49, %v3986_v9  ;;  %vm2330_vm7 = vcmp.lt.s32.totalorder %v2329_v10, 2  ;;  %v2006_v46 = vsub.s32 4, %v3924_v15 }
 0x141   :  { %v1917_v22 = vsel %vm1915_vm8, %v1916_v23, %v2760_v13  ;;  %v2336_v25 = vsel %vm2334_vm11, %v1916_v23, %v2760_v13  ;;  %v1999_v0 = vor.u32 4788187, %v1998_v4  ;;  %v2002_v51 = vcvt.s32.f32 %v1995_v60 }
 0x142   :  { %v1914_v1 = vsel %vm1912_vm9, %v2758_v29, %v1913_v41  ;;  %v2083_v53 = vsel %vm2081_vm12, %v2082_v56, %v3987_v63  ;;  %v2333_v8 = vsel %vm2331_vm10, %v2758_v29, %v1913_v41  ;;  %vm1922_vm15 = vcmp.lt.s32.totalorder %v3633_v16, 0 }
 0x143   :  { %v1918_v38 = vsel %vm1911_vm6, %v1914_v1, %v1917_v22  ;;  %v2084_v40 = vadd.s32 %v2083_v53, %v2079_v27  ;;  %v2000_v33 = vand.u32 2147483647, %v1999_v0  ;;  %v2337_v7 = vsel %vm2330_vm7, %v2333_v8, %v2336_v25 }
 0x144   :  { %v1919_v20 = vsel %vm1908_vm2, nan, %v1918_v38  ;;  %v2338_v36 = vsel %vm1908_vm2, nan, %v2337_v7  ;;  %v2007_v31 = vsel %vm1922_vm15, %v2006_v46, %v3924_v15  ;;  %vm1921_vm13 = vcmp.le.f32.partialorder %v1920_v11, 0.7853982 }
 0x145   :  { %2130 = vst [vmem:[#allocation5 + $0x88] sm:$0xff] %v1919_v20  ;;  %v2085_v42 = vadd.s32 536870912, %v2084_v40  ;;  %v2003_v44 = vmul.f32 %v2002_v51, %v2000_v33  ;;  %2547 = vst [vmem:[#allocation5 + $0xa8] sm:$0xff] %v2338_v36  ;;  %v2009_v34 = vsel %vm1921_vm13, 0, %v2007_v31  ;;  %v2080_v11 = vadd.s32 %v3986_v9, %v4002_v49 }
 0x146   :  { %v2013_v35 = vadd.s32 3, %v2009_v34  ;;  %v2432_v30 = vand.u32 3, %v2009_v34  ;;  %vm2012_vm2 = vweird.f32 %v3633_v16  ;;  %vm2026_vm8 = vcmp.lt.s32.totalorder %v3819_v19, 0 }
 0x147   :  { %v2086_v12 = vshrl.u32 %v2085_v42, 30  ;;  %v2004_v52 = vxor.u32 2147483648, %v2003_v44  ;;  %vm2025_vm9 = vcmp.le.f32.partialorder %v2024_v21, 0.7853982 }
 0x148   :  { %v2014_v43 = vand.u32 3, %v2013_v35  ;;  %vm2434_vm4 = vcmp.eq.s32.totalorder %v2432_v30, 0  ;;  %vm2437_vm1 = vcmp.eq.s32.totalorder %v2432_v30, 2  ;;  %vm2433_vm6 = vcmp.lt.s32.totalorder %v2432_v30, 2 }
 0x149   :  { %v2087_v2 = vshll.u32 %v2086_v12, 30  ;;  %v2005_v28 = vsel %vm1922_vm15, %v2004_v52, %v2003_v44  ;;  %v2110_v56 = vsub.s32 4, %v2086_v12 }
 0x14a   :  { %v2008_v17 = vsel %vm1921_vm13, %v3633_v16, %v2005_v28  ;;  %vm2016_vm0 = vcmp.eq.s32.totalorder %v2014_v43, 0  ;;  %vm2019_vm14 = vcmp.eq.s32.totalorder %v2014_v43, 2  ;;  %vm2015_vm5 = vcmp.lt.s32.totalorder %v2014_v43, 2 }
 0x14b   :  { %v2088_v26 = vsub.s32 %v2084_v40, %v2087_v2  ;;  %2761 = vcosq.f32 %v2008_v17  ;;  %v2111_v27 = vsel %vm2026_vm8, %v2110_v56, %v2086_v12 }
 0x14c   :  { %2763 = vsinq.f32 %v2008_v17  ;;  %v2113_v4 = vsel %vm2025_vm9, 0, %v2111_v27 }
 0x14d   :  { %v2090_v62 = vsub.s32 0, %v2088_v26  ;;  %v2117_v22 = vadd.s32 3, %v2113_v4  ;;  %v2535_v1 = vand.u32 3, %v2113_v4 }
 0x14f   :  { %v2644_v5 = vmin.u32 %v2090_v62, %v2088_v26  ;;  %v2118_v25 = vand.u32 3, %v2117_v22  ;;  %vm2540_vm10 = vcmp.eq.s32.totalorder %v2535_v1, 2  ;;  %vm2537_vm7 = vcmp.eq.s32.totalorder %v2535_v1, 0 }
 0x150   :  { %vm2536_vm13 = vcmp.lt.s32.totalorder %v2535_v1, 2 }
 0x151   :  { %v2092_v3 = vclz %v2644_v5  ;;  %vm2123_vm11 = vcmp.eq.s32.totalorder %v2118_v25, 2  ;;  %vm2120_vm12 = vcmp.eq.s32.totalorder %v2118_v25, 0  ;;  %vm2119_vm15 = vcmp.lt.s32.totalorder %v2118_v25, 2 }
 0x153   :  { %v2645_v15 = vadd.s32 4294967294, %v2092_v3 }
 0x155   :  { %vm2646_vm3 = vcmp.lt.s32.totalorder %v2645_v15, 0  ;;  %v2762_v55 = vpop.eup %2761 }
 0x156   :  { %v2095_v18 = vsel %vm2646_vm3, 0, %v2645_v15  ;;  %v2764_v61 = vpop.eup %2763  ;;  %v2020_v58 = vxor.u32 2147483648, %v2762_v55 }
 0x157   :  { %v2096_v10 = vsub.s32 32, %v2095_v18  ;;  %v2097_v39 = vshll.u32 %v2088_v26, %v2095_v18  ;;  %v2100_v63 = vsub.s32 4294967266, %v2095_v18  ;;  %v2017_v54 = vxor.u32 2147483648, %v2764_v61 }
 0x158   :  { %v2021_v57 = vsel %vm2019_vm14, %v2020_v58, %v2764_v61  ;;  %v2439_v9 = vsel %vm2437_vm1, %v2020_v58, %v2764_v61 }
 0x159   :  { %v2098_v14 = vshrl.u32 %v2080_v11, %v2096_v10  ;;  %v2101_v45 = vadd.s32 127, %v2100_v63  ;;  %v2018_v47 = vsel %vm2016_vm0, %v2762_v55, %v2017_v54  ;;  %v2436_v50 = vsel %vm2434_vm4, %v2762_v55, %v2017_v54 }
 0x15a   :  { %v2022_v59 = vsel %vm2015_vm5, %v2018_v47, %v2021_v57  ;;  %v2440_v49 = vsel %vm2433_vm6, %v2436_v50, %v2439_v9  ;;  %vm2116_vm0 = vweird.f32 %v3819_v19 }
 0x15b   :  { %v2099_v32 = vor.u32 %v2098_v14, %v2097_v39  ;;  %v2102_v37 = vshll.u32 %v2101_v45, 23  ;;  %v2023_v6 = vsel %vm2012_vm2, nan, %v2022_v59  ;;  %v2441_v29 = vsel %vm2012_vm2, nan, %v2440_v49 }
 0x15c   :  { %2131 = vst [vmem:[#allocation5 + $0x90] sm:$0xff] %v2023_v6  ;;  %2548 = vst [vmem:[#allocation5 + $0xb0] sm:$0xff] %v2441_v29 }
 0x15d   :  { %v2103_v48 = vor.u32 4788187, %v2102_v37  ;;  %v2106_v16 = vcvt.s32.f32 %v2099_v32 }
 0x15f   :  { %v2104_v24 = vand.u32 2147483647, %v2103_v48 }
 0x161   :  { %v2107_v13 = vmul.f32 %v2106_v16, %v2104_v24 }
 0x163   :  { %v2108_v23 = vxor.u32 2147483648, %v2107_v13 }
 0x165   :  { %v2109_v41 = vsel %vm2026_vm8, %v2108_v23, %v2107_v13 }
 0x166   :  { %v2112_v60 = vsel %vm2025_vm9, %v3819_v19, %v2109_v41 }
 0x167   :  { %2765 = vcosq.f32 %v2112_v60 }
 0x168   :  { %2767 = vsinq.f32 %v2112_v60 }
 0x171   :  { %v2766_v0 = vpop.eup %2765 }
 0x172   :  { %v2768_v51 = vpop.eup %2767  ;;  %v2124_v53 = vxor.u32 2147483648, %v2766_v0 }
 0x173   :  { %v2121_v21 = vxor.u32 2147483648, %v2768_v51 }
 0x174   :  { %v2125_v38 = vsel %vm2123_vm11, %v2124_v53, %v2768_v51  ;;  %v2542_v46 = vsel %vm2540_vm10, %v2124_v53, %v2768_v51 }
 0x175   :  { %v2122_v40 = vsel %vm2120_vm12, %v2766_v0, %v2121_v21  ;;  %v2539_v8 = vsel %vm2537_vm7, %v2766_v0, %v2121_v21 }
 0x176   :  { %v2126_v20 = vsel %vm2119_vm15, %v2122_v40, %v2125_v38  ;;  %v2543_v33 = vsel %vm2536_vm13, %v2539_v8, %v2542_v46 }
 0x177   :  { %v2127_v7 = vsel %vm2116_vm0, nan, %v2126_v20  ;;  %v2544_v42 = vsel %vm2116_vm0, nan, %v2543_v33 }
 0x178   :  { %2132 = vst [vmem:[#allocation5 + $0x98] sm:$0xff] %v2127_v7  ;;  %2549 = vst [vmem:[#allocation5 + $0xb8] sm:$0xff] %v2544_v42 }
 0x179   :  { %2806 = shalt.err (!%p2803_p12)
}
 0x17a   :  { %s2807_s22 = scalar_lea.hbm %s4049_s1, 3072 }
 0x17b   :  { %p2808_p13 = scmp.ne.s32.totalorder %s4049_s1, %s2807_s22  ;;  %p2811_p0 = scmp.lt.u32.totalorder %s2807_s22, %s4049_s1 }
 0x17d   :  { %p2813_p1 = pnand %p2811_p0, %p2808_p13 }
 0x17f   :  { %2816 = shalt.err (!%p2813_p1)
}
 0x180   :  { %s2829_s27 = smov 512   ;;  %s2830_s28 = smov 32  }
 0x181   :  { %2561 = dma.vmem_to_hbm [thread:$0]  %s2556_s18, 3072, %s4049_s1, [#allocation4], %s2829_s27, %s2829_s27, %s2830_s28  }
 0x182   :  { %2819 = dma.done.wait [#allocation4], 3072  }
 0x183   :  { %2820 = vsyncadd [#allocation4], 4294964224 }
 0x184   :  { %2565 = vsyncpa [#allocation3], 1 }
 0x185   :  { %2566 = vsyncpa [#allocation4], 1 }

</bundles_post_ra>
